<compile_context>
chip_gen: v7x
topology: tpu7x:2x2x1
jax: 0.10.0
libtpu: 0.0.40
codegen_flags: <defaults>
</compile_context>

<pallas_src>
import functools

import jax
import jax.numpy as jnp
from jax.experimental import pallas as pl
from jax.experimental.pallas import tpu as pltpu

HIDDEN = 128
NEG_SLOPE = 0.01            # F.leaky_relu default
ROW_TILE_TARGET = 512       # rows per dense-layer grid step (VMEM-safe on v7x's 64 MiB)
TIME_CHUNK = 16             # GRU timesteps per grid step (amortizes ~0.35us/step overhead)
VMEM_LIMIT = 32 * 1024 * 1024


def _round_up(x, m):
    return ((x + m - 1) // m) * m


def _pick_row_tile(rows, target=ROW_TILE_TARGET):
    """Largest row tile <= target that divides `rows` and is a multiple of 8."""
    if rows <= target:
        return rows
    for cand in range(target - (target % 8), 7, -8):
        if rows % cand == 0:
            return cand
    return rows


# --------------------- K1: fc1 + leaky_relu + GRU input gates ---------------------

def _fc1_gates_kernel(x0_ref, w1_ref, b1_ref, wih_ref, bih_ref, gi_ref):
    y = jnp.dot(x0_ref[...], w1_ref[...], preferred_element_type=jnp.float32) + b1_ref[...]
    x1 = jnp.where(y >= 0.0, y, NEG_SLOPE * y)
    gi_ref[...] = (jnp.dot(x1.astype(jnp.bfloat16), wih_ref[...],
                           preferred_element_type=jnp.float32) + bih_ref[...])


def fc1_gates(x0_rows, w1, b1, w_ih, b_ih, *, row_tile):
    R, d1 = x0_rows.shape
    H = w1.shape[1]
    H3 = w_ih.shape[1]
    return pl.pallas_call(
        _fc1_gates_kernel,
        out_shape=jax.ShapeDtypeStruct((R, H3), jnp.float32),
        grid=(R // row_tile,),
        in_specs=[
            pl.BlockSpec((row_tile, d1), lambda i: (i, 0)),
            pl.BlockSpec((d1, H), lambda i: (0, 0)),     # weights stay VMEM-resident
            pl.BlockSpec((1, H), lambda i: (0, 0)),
            pl.BlockSpec((H, H3), lambda i: (0, 0)),
            pl.BlockSpec((1, H3), lambda i: (0, 0)),
        ],
        out_specs=pl.BlockSpec((row_tile, H3), lambda i: (i, 0)),
        compiler_params=pltpu.CompilerParams(
            dimension_semantics=("parallel",),
            vmem_limit_bytes=VMEM_LIMIT),
    )(x0_rows, w1, b1, w_ih, b_ih)


# ----------------------------- K2: GRU recurrence ---------------------------------

def _gru_kernel(gi_ref, whh_ref, bhh_ref, o_ref, h_scratch):
    # New batch chunk -> time restarts at 0 -> reset hidden state.
    @pl.when(pl.program_id(1) == 0)
    def _():
        h_scratch[...] = jnp.zeros_like(h_scratch)

    H = whh_ref.shape[0]
    tchunk, bchunk, _ = gi_ref.shape
    w_hh = whh_ref[...]                                          # bf16, VMEM-resident
    b_hh = jnp.broadcast_to(bhh_ref[...], (bchunk, 3 * H))       # hoisted out of loop

    def step(i, carry):
        gi = gi_ref[i]                                           # (bchunk, 3H) f32
        h = h_scratch[...]
        gh = jnp.dot(h.astype(jnp.bfloat16), w_hh,
                     preferred_element_type=jnp.float32) + b_hh
        r = jax.nn.sigmoid(gi[:, 0:H] + gh[:, 0:H])
        z = jax.nn.sigmoid(gi[:, H:2 * H] + gh[:, H:2 * H])
        n = jnp.tanh(gi[:, 2 * H:] + r * gh[:, 2 * H:])
        h_new = (1.0 - z) * n + z * h
        h_scratch[...] = h_new
        o_ref[i] = h_new
        return carry

    jax.lax.fori_loop(0, tchunk, step, 0, unroll=True)


def gru_forward(gi, w_hh, b_hh, *, time_chunk, batch_chunk):
    # gi: (T_pad, B_pad, 3H) time-major precomputed input gates.
    T_pad, B_pad, H3 = gi.shape
    H = H3 // 3
    grid = (B_pad // batch_chunk, T_pad // time_chunk)
    return pl.pallas_call(
        _gru_kernel,
        out_shape=jax.ShapeDtypeStruct((T_pad, B_pad, H), jnp.float32),
        grid=grid,
        in_specs=[
            pl.BlockSpec((time_chunk, batch_chunk, H3), lambda b, c: (c, b, 0)),
            pl.BlockSpec((H, H3), lambda b, c: (0, 0)),
            pl.BlockSpec((1, H3), lambda b, c: (0, 0)),
        ],
        out_specs=pl.BlockSpec((time_chunk, batch_chunk, H), lambda b, c: (c, b, 0)),
        scratch_shapes=[pltpu.VMEM((batch_chunk, H), jnp.float32)],
        # Time (last axis) carries the recurrence -> MUST stay "arbitrary" (serial).
        # Batch chunks are independent sequences -> safe "parallel" (megacore/v7x).
        compiler_params=pltpu.CompilerParams(
            dimension_semantics=("parallel", "arbitrary"),
            vmem_limit_bytes=VMEM_LIMIT),
    )(gi, w_hh, b_hh)


# -------------------------- K3: fc2 + leaky_relu + fc3 -----------------------------

def _fc23_kernel(x1_ref, in1_ref, w2_ref, b2_ref, w3a_ref, w3b_ref, b3_ref, o_ref):
    y = jnp.dot(in1_ref[...], w2_ref[...], preferred_element_type=jnp.float32) + b2_ref[...]
    x2 = jnp.where(y >= 0.0, y, NEG_SLOPE * y)
    q = jnp.dot(x1_ref[...].astype(jnp.bfloat16), w3a_ref[...],
                preferred_element_type=jnp.float32)
    q = q + jnp.dot(x2.astype(jnp.bfloat16), w3b_ref[...],
                    preferred_element_type=jnp.float32)
    o_ref[...] = q + b3_ref[...]


def fc2_fc3(x1_rows, in1_rows, w2, b2, w3a, w3b, b3, *, row_tile):
    R, H = x1_rows.shape
    d2 = in1_rows.shape[1]
    nact = w3a.shape[1]
    return pl.pallas_call(
        _fc23_kernel,
        out_shape=jax.ShapeDtypeStruct((R, nact), jnp.float32),
        grid=(R // row_tile,),
        in_specs=[
            pl.BlockSpec((row_tile, H), lambda i: (i, 0)),
            pl.BlockSpec((row_tile, d2), lambda i: (i, 0)),
            pl.BlockSpec((d2, H), lambda i: (0, 0)),
            pl.BlockSpec((1, H), lambda i: (0, 0)),
            pl.BlockSpec((H, nact), lambda i: (0, 0)),
            pl.BlockSpec((H, nact), lambda i: (0, 0)),
            pl.BlockSpec((1, nact), lambda i: (0, 0)),
        ],
        out_specs=pl.BlockSpec((row_tile, nact), lambda i: (i, 0)),
        compiler_params=pltpu.CompilerParams(
            dimension_semantics=("parallel",),
            vmem_limit_bytes=VMEM_LIMIT),
    )(x1_rows, in1_rows, w2, b2, w3a, w3b, b3)


# ------------------------------ JAX glue -----------------------------------

def build_inputs(obs, actions_onehot, n_agents, n_actions):
    """Mirror of COMACritic._build_inputs with t=None, state_critic=False."""
    bs, max_t = obs.shape[:2]
    obs_flat = obs.reshape(bs, max_t, 1, -1)
    obs_rep = jnp.concatenate([obs_flat] * n_agents, axis=-2)            # (bs,T,nag,obs*nag)

    actions = actions_onehot.reshape(bs, max_t, 1, -1)
    actions = jnp.tile(actions, (1, 1, n_agents, 1))                     # (bs,T,nag,nag*nact)

    agent_mask = 1.0 - jnp.eye(n_agents, dtype=jnp.float32)
    agent_mask = jnp.repeat(agent_mask.reshape(-1, 1), n_actions, axis=1).reshape(n_agents, -1)
    other_agent_actions = actions * agent_mask[None, None]

    last_actions = jnp.concatenate(
        [jnp.zeros_like(actions_onehot[:, 0:1]), actions_onehot[:, :-1]], axis=1)
    last_actions = jnp.tile(last_actions.reshape(bs, max_t, 1, -1), (1, 1, n_agents, 1))

    agent_ids = jnp.broadcast_to(jnp.eye(n_agents, dtype=jnp.float32)[None, None],
                                 (bs, max_t, n_agents, n_agents))

    inputs0 = jnp.concatenate([obs_rep, last_actions, agent_ids], axis=-1)
    return inputs0, other_agent_actions


@functools.partial(jax.jit, static_argnums=(3, 4))
def coma_critic_forward(params, obs, actions_onehot, n_agents, n_actions):
    inputs0, inputs1 = build_inputs(obs, actions_onehot, n_agents, n_actions)
    bs, T, nag, d1 = inputs0.shape
    d2 = inputs1.shape[-1]
    B = bs * nag

    # bf16 weight copies for the MXU (biases + accumulation + gate math stay f32).
    w1 = params['w1'].astype(jnp.bfloat16)
    w_ih = params['w_ih'].astype(jnp.bfloat16)
    w_hh = params['w_hh'].astype(jnp.bfloat16)
    w2 = params['w2'].astype(jnp.bfloat16)
    w3a = params['w3_a'].astype(jnp.bfloat16)
    w3b = params['w3_b'].astype(jnp.bfloat16)

    # Time-major (T, B, feat); pad B to a sublane multiple and T to a chunk multiple.
    # Padded rows/steps compute throwaway values and are sliced off at the end.
    b_pad = _round_up(B, 8)
    time_chunk = min(TIME_CHUNK, T)
    t_pad = _round_up(T, time_chunk)
    batch_chunk = b_pad // 2 if (b_pad % 16 == 0 and b_pad >= 16) else b_pad

    def to_time_major(a):
        a = a.transpose(1, 0, 2, 3).reshape(T, B, a.shape[-1])
        return jnp.pad(a, ((0, t_pad - T), (0, b_pad - B), (0, 0)))

    x0 = to_time_major(inputs0).astype(jnp.bfloat16)          # (T_pad, B_pad, d1)
    in1 = to_time_major(inputs1).astype(jnp.bfloat16)         # (T_pad, B_pad, d2)

    rows = t_pad * b_pad
    row_tile = _pick_row_tile(rows)

    # K1: fc1 + leaky_relu + GRU input-gate precompute (one big row-tiled pass).
    gi = fc1_gates(x0.reshape(rows, d1), w1, params['b1'], w_ih, params['b_ih'],
                   row_tile=row_tile)
    gi = gi.reshape(t_pad, b_pad, 3 * HIDDEN)

    # K2: GRU recurrence (only h @ W_hh inside the serial time loop).
    hs = gru_forward(gi, w_hh, params['b_hh'],
                     time_chunk=time_chunk, batch_chunk=batch_chunk)  # (T_pad,B_pad,H)

    # K3: fc2 + leaky_relu + fc3 fused; only the narrow q slab is written to HBM.
    q = fc2_fc3(hs.reshape(rows, HIDDEN), in1.reshape(rows, d2),
                w2, params['b2'], w3a, w3b, params['b3'], row_tile=row_tile)

    q = q.reshape(t_pad, b_pad, n_actions)[:T, :B]             # drop padding (narrow)
    return q.reshape(T, bs, nag, n_actions).transpose(1, 0, 2, 3)


# -------------------------- pure-JAX reference ------------------------------

def coma_critic_reference(params, obs, actions_onehot, n_agents, n_actions):
    inputs0, inputs1 = build_inputs(obs, actions_onehot, n_agents, n_actions)
    bs, tr, nag, dim = inputs0.shape
    lrelu = lambda v: jnp.where(v >= 0.0, v, NEG_SLOPE * v)

    x0 = inputs0.transpose(0, 2, 1, 3).reshape(bs * nag, tr, dim)
    x1 = lrelu(x0 @ params['w1'] + params['b1'])

    def step(h, xt):
        gi = xt @ params['w_ih'] + params['b_ih']
        gh = h @ params['w_hh'] + params['b_hh']
        r = jax.nn.sigmoid(gi[:, :HIDDEN] + gh[:, :HIDDEN])
        z = jax.nn.sigmoid(gi[:, HIDDEN:2 * HIDDEN] + gh[:, HIDDEN:2 * HIDDEN])
        n = jnp.tanh(gi[:, 2 * HIDDEN:] + r * gh[:, 2 * HIDDEN:])
        h_new = (1.0 - z) * n + z * h
        return h_new, h_new

    h0 = jnp.zeros((bs * nag, HIDDEN), jnp.float32)
    _, hs = jax.lax.scan(step, h0, x1.transpose(1, 0, 2))
    x1 = hs.transpose(1, 0, 2).reshape(bs, nag, tr, HIDDEN).transpose(0, 2, 1, 3)

    x2 = lrelu(inputs1 @ params['w2'] + params['b2']).reshape(bs, tr, nag, HIDDEN)
    x = jnp.concatenate([x1, x2], axis=-1)
    w3 = jnp.concatenate([params['w3_a'], params['w3_b']], axis=0)
    return x @ w3 + params['b3']


# --------------------------------- main -------------------------------------

if __name__ == "__main__":
    bs, T = 2, 8
    n_agents, n_actions, obs_dim = 3, 5, 10

    in0_dim = obs_dim * n_agents + n_actions * n_agents + n_agents   # 48
    in1_dim = n_actions * n_agents                                   # 15 (state_critic=False)

    key = jax.random.PRNGKey(0)
    ks = jax.random.split(key, 12)

    def uni(k, shape, scale=0.1):
        return jax.random.uniform(k, shape, jnp.float32, -scale, scale)

    params = {
        'w1': uni(ks[0], (in0_dim, HIDDEN)),
        'b1': uni(ks[1], (1, HIDDEN)),
        'w2': uni(ks[2], (in1_dim, HIDDEN)),
        'b2': uni(ks[3], (1, HIDDEN)),
        # GRU (gates in PyTorch order r,z,n), stored pre-transposed: (in, 3H)
        'w_ih': uni(ks[4], (HIDDEN, 3 * HIDDEN)),
        'w_hh': uni(ks[5], (HIDDEN, 3 * HIDDEN)),
        'b_ih': uni(ks[6], (1, 3 * HIDDEN)),
        'b_hh': uni(ks[7], (1, 3 * HIDDEN)),
        # fc3 weight (2H, n_actions) split into the x1 / x2 halves
        'w3_a': uni(ks[8], (HIDDEN, n_actions)),
        'w3_b': uni(ks[9], (HIDDEN, n_actions)),
        'b3': uni(ks[10], (1, n_actions)),
    }

    kk = jax.random.split(ks[11], 2)
    obs = jax.random.normal(kk[0], (bs, T, n_agents, obs_dim), jnp.float32)
    act_idx = jax.random.randint(kk[1], (bs, T, n_agents), 0, n_actions)
    actions_onehot = jax.nn.one_hot(act_idx, n_actions, dtype=jnp.float32)

    q = coma_critic_forward(params, obs, actions_onehot, n_agents, n_actions)
    q = jax.block_until_ready(q)

    q_ref = coma_critic_reference(params, obs, actions_onehot, n_agents, n_actions)
    assert q.shape == (bs, T, n_agents, n_actions)
    # bf16 matmul operands (f32 accumulation) vs f32 reference -> modest tolerance.
    assert jnp.allclose(q, q_ref, atol=2e-2, rtol=2e-2)

    print("KERNEL_OK")
</pallas_src>

<mosaic_0001>
module attributes {stable_mosaic.version = 11 : i64} {
  func.func @_fc1_gates_kernel(%arg0: i32, %arg1: memref<64x48xbf16, #tpu.memory_space<vmem>>, %arg2: memref<48x128xbf16, #tpu.memory_space<vmem>>, %arg3: memref<1x128xf32, #tpu.memory_space<vmem>>, %arg4: memref<128x384xbf16, #tpu.memory_space<vmem>>, %arg5: memref<1x384xf32, #tpu.memory_space<vmem>>, %arg6: memref<64x384xf32, #tpu.memory_space<vmem>>) attributes {dimension_semantics = [#tpu.dimension_semantics<parallel>], iteration_bounds = array<i64: 1>, scalar_prefetch = 0 : i64, scratch_operands = 0 : i64, tpu.core_type = #tpu.core_type<tc>, window_params = [{transform_indices = @transform_0, window_bounds = array<i64: 64, 48>}, {pipeline_mode = #tpu.pipeline_mode<synchronous>, transform_indices = @transform_1, window_bounds = array<i64: 48, 128>}, {pipeline_mode = #tpu.pipeline_mode<synchronous>, transform_indices = @transform_2, window_bounds = array<i64: 1, 128>}, {pipeline_mode = #tpu.pipeline_mode<synchronous>, transform_indices = @transform_3, window_bounds = array<i64: 128, 384>}, {pipeline_mode = #tpu.pipeline_mode<synchronous>, transform_indices = @transform_4, window_bounds = array<i64: 1, 384>}, {transform_indices = @transform_5, window_bounds = array<i64: 64, 384>}]} {
    %c0 = arith.constant 0 : index
    %c0_0 = arith.constant 0 : index
    %0 = vector.load %arg1[%c0, %c0_0] : memref<64x48xbf16, #tpu.memory_space<vmem>>, vector<64x48xbf16>
    %c0_1 = arith.constant 0 : index
    %c0_2 = arith.constant 0 : index
    %1 = vector.load %arg2[%c0_1, %c0_2] : memref<48x128xbf16, #tpu.memory_space<vmem>>, vector<48x128xbf16>
    %cst = arith.constant dense<0.000000e+00> : vector<64x128xf32>
    %2 = tpu.matmul %0, %1, %cst {dimension_numbers = #tpu.dot_dimension_numbers<[1], [0], [0], [1], [0, 0, 1, 1], [], []>} : vector<64x48xbf16>, vector<48x128xbf16>, vector<64x128xf32> -> vector<64x128xf32>
    %c0_3 = arith.constant 0 : index
    %c0_4 = arith.constant 0 : index
    %3 = vector.load %arg3[%c0_3, %c0_4] : memref<1x128xf32, #tpu.memory_space<vmem>>, vector<1x128xf32>
    %4 = vector.broadcast %3 : vector<1x128xf32> to vector<64x128xf32>
    %5 = arith.addf %2, %4 : vector<64x128xf32>
    %cst_5 = arith.constant 0.000000e+00 : f32
    %6 = vector.broadcast %cst_5 : f32 to vector<64x128xf32>
    %7 = arith.cmpf oge, %5, %6 : vector<64x128xf32>
    %cst_6 = arith.constant 0.00999999977 : f32
    %8 = vector.broadcast %cst_6 : f32 to vector<64x128xf32>
    %9 = arith.mulf %8, %5 : vector<64x128xf32>
    %10 = arith.select %7, %5, %9 : vector<64x128xi1>, vector<64x128xf32>
    %11 = arith.truncf %10 : vector<64x128xf32> to vector<64x128xbf16>
    %c0_7 = arith.constant 0 : index
    %c0_8 = arith.constant 0 : index
    %12 = vector.load %arg4[%c0_7, %c0_8] : memref<128x384xbf16, #tpu.memory_space<vmem>>, vector<128x384xbf16>
    %cst_9 = arith.constant dense<0.000000e+00> : vector<64x384xf32>
    %13 = tpu.matmul %11, %12, %cst_9 {dimension_numbers = #tpu.dot_dimension_numbers<[1], [0], [0], [1], [0, 0, 1, 1], [], []>} : vector<64x128xbf16>, vector<128x384xbf16>, vector<64x384xf32> -> vector<64x384xf32>
    %c0_10 = arith.constant 0 : index
    %c0_11 = arith.constant 0 : index
    %14 = vector.load %arg5[%c0_10, %c0_11] : memref<1x384xf32, #tpu.memory_space<vmem>>, vector<1x384xf32>
    %15 = vector.broadcast %14 : vector<1x384xf32> to vector<64x384xf32>
    %16 = arith.addf %13, %15 : vector<64x384xf32>
    %c0_12 = arith.constant 0 : index
    %c0_13 = arith.constant 0 : index
    %17 = vector.load %arg6[%c0_12, %c0_13] : memref<64x384xf32, #tpu.memory_space<vmem>>, vector<64x384xf32>
    tpu.vector_store %arg6[%c0_12, %c0_13], %16 {strides = array<i32>} : memref<64x384xf32, #tpu.memory_space<vmem>>, vector<64x384xf32>,
    return
  }
  func.func @transform_0(%arg0: i32) -> (i32, i32) {
    %c0_i32 = arith.constant 0 : i32
    %c0_i32_0 = arith.constant 0 : i32
    return %arg0, %c0_i32 : i32, i32
  }
  func.func @transform_1(%arg0: i32) -> (i32, i32) {
    %c0_i32 = arith.constant 0 : i32
    %c0_i32_0 = arith.constant 0 : i32
    %c0_i32_1 = arith.constant 0 : i32
    return %c0_i32, %c0_i32_0 : i32, i32
  }
  func.func @transform_2(%arg0: i32) -> (i32, i32) {
    %c0_i32 = arith.constant 0 : i32
    %c0_i32_0 = arith.constant 0 : i32
    %c0_i32_1 = arith.constant 0 : i32
    return %c0_i32, %c0_i32_0 : i32, i32
  }
  func.func @transform_3(%arg0: i32) -> (i32, i32) {
    %c0_i32 = arith.constant 0 : i32
    %c0_i32_0 = arith.constant 0 : i32
    %c0_i32_1 = arith.constant 0 : i32
    return %c0_i32, %c0_i32_0 : i32, i32
  }
  func.func @transform_4(%arg0: i32) -> (i32, i32) {
    %c0_i32 = arith.constant 0 : i32
    %c0_i32_0 = arith.constant 0 : i32
    %c0_i32_1 = arith.constant 0 : i32
    return %c0_i32, %c0_i32_0 : i32, i32
  }
  func.func @transform_5(%arg0: i32) -> (i32, i32) {
    %c0_i32 = arith.constant 0 : i32
    %c0_i32_0 = arith.constant 0 : i32
    return %arg0, %c0_i32 : i32, i32
  }
}

module attributes {stable_mosaic.version = 11 : i64} {
  func.func @_gru_kernel(%arg0: i32, %arg1: i32, %arg2: memref<8x8x384xf32, #tpu.memory_space<vmem>>, %arg3: memref<128x384xbf16, #tpu.memory_space<vmem>>, %arg4: memref<1x384xf32, #tpu.memory_space<vmem>>, %arg5: memref<8x8x128xf32, #tpu.memory_space<vmem>>, %arg6: memref<8x128xf32, #tpu.memory_space<vmem>>) attributes {dimension_semantics = [#tpu.dimension_semantics<parallel>, #tpu.dimension_semantics<arbitrary>], iteration_bounds = array<i64: 1, 1>, scalar_prefetch = 0 : i64, scratch_operands = 1 : i64, tpu.core_type = #tpu.core_type<tc>, window_params = [{transform_indices = @transform_0, window_bounds = array<i64: 8, 8, 384>}, {pipeline_mode = #tpu.pipeline_mode<synchronous>, transform_indices = @transform_1, window_bounds = array<i64: 128, 384>}, {pipeline_mode = #tpu.pipeline_mode<synchronous>, transform_indices = @transform_2, window_bounds = array<i64: 1, 384>}, {transform_indices = @transform_3, window_bounds = array<i64: 8, 8, 128>}]} {
    %c0_i32 = arith.constant 0 : i32
    %0 = arith.cmpi eq, %arg1, %c0_i32 : i32
    %1 = arith.extui %0 : i1 to i32
    %c0_i32_0 = arith.constant 0 : i32
    %2 = arith.cmpi ne, %1, %c0_i32_0 : i32
    scf.if %2 {
      %cst_100 = arith.constant 0.000000e+00 : f32
      %311 = vector.broadcast %cst_100 : f32 to vector<8x128xf32>
      %c0_101 = arith.constant 0 : index
      %c0_102 = arith.constant 0 : index
      %312 = vector.load %arg6[%c0_101, %c0_102] : memref<8x128xf32, #tpu.memory_space<vmem>>, vector<8x128xf32>
      tpu.vector_store %arg6[%c0_101, %c0_102], %311 {strides = array<i32>} : memref<8x128xf32, #tpu.memory_space<vmem>>, vector<8x128xf32>,
    } else {
    }
    %c0 = arith.constant 0 : index
    %c0_1 = arith.constant 0 : index
    %3 = vector.load %arg3[%c0, %c0_1] : memref<128x384xbf16, #tpu.memory_space<vmem>>, vector<128x384xbf16>
    %c0_2 = arith.constant 0 : index
    %c0_3 = arith.constant 0 : index
    %4 = vector.load %arg4[%c0_2, %c0_3] : memref<1x384xf32, #tpu.memory_space<vmem>>, vector<1x384xf32>
    %5 = vector.shape_cast %4 : vector<1x384xf32> to vector<1x384xf32>
    %6 = vector.broadcast %5 : vector<1x384xf32> to vector<8x384xf32>
    %c0_i32_4 = arith.constant 0 : i32
    %7 = arith.index_cast %c0_i32_4 : i32 to index
    %c0_5 = arith.constant 0 : index
    %c0_6 = arith.constant 0 : index
    %8 = vector.load %arg2[%7, %c0_5, %c0_6] : memref<8x8x384xf32, #tpu.memory_space<vmem>>, vector<1x8x384xf32>
    %9 = vector.shape_cast %8 : vector<1x8x384xf32> to vector<8x384xf32>
    %c0_7 = arith.constant 0 : index
    %c0_8 = arith.constant 0 : index
    %10 = vector.load %arg6[%c0_7, %c0_8] : memref<8x128xf32, #tpu.memory_space<vmem>>, vector<8x128xf32>
    %11 = arith.truncf %10 : vector<8x128xf32> to vector<8x128xbf16>
    %cst = arith.constant dense<0.000000e+00> : vector<8x384xf32>
    %12 = tpu.matmul %11, %3, %cst {dimension_numbers = #tpu.dot_dimension_numbers<[1], [0], [0], [1], [0, 0, 1, 1], [], []>} : vector<8x128xbf16>, vector<128x384xbf16>, vector<8x384xf32> -> vector<8x384xf32>
    %13 = arith.addf %12, %6 : vector<8x384xf32>
    %14 = vector.extract_strided_slice %9 {offsets = [0, 0], sizes = [8, 128], strides = [1, 1]} : vector<8x384xf32> to vector<8x128xf32>
    %15 = vector.extract_strided_slice %13 {offsets = [0, 0], sizes = [8, 128], strides = [1, 1]} : vector<8x384xf32> to vector<8x128xf32>
    %16 = arith.addf %14, %15 : vector<8x128xf32>
    %17 = arith.negf %16 : vector<8x128xf32>
    %18 = math.exp %17 : vector<8x128xf32>
    %cst_9 = arith.constant 1.000000e+00 : f32
    %19 = vector.broadcast %cst_9 : f32 to vector<8x128xf32>
    %20 = arith.addf %19, %18 : vector<8x128xf32>
    %21 = arith.divf %19, %20 : vector<8x128xf32>
    %22 = vector.extract_strided_slice %9 {offsets = [0, 128], sizes = [8, 128], strides = [1, 1]} : vector<8x384xf32> to vector<8x128xf32>
    %23 = vector.extract_strided_slice %13 {offsets = [0, 128], sizes = [8, 128], strides = [1, 1]} : vector<8x384xf32> to vector<8x128xf32>
    %24 = arith.addf %22, %23 : vector<8x128xf32>
    %25 = arith.negf %24 : vector<8x128xf32>
    %26 = math.exp %25 : vector<8x128xf32>
    %cst_10 = arith.constant 1.000000e+00 : f32
    %27 = vector.broadcast %cst_10 : f32 to vector<8x128xf32>
    %28 = arith.addf %27, %26 : vector<8x128xf32>
    %29 = arith.divf %27, %28 : vector<8x128xf32>
    %30 = vector.extract_strided_slice %9 {offsets = [0, 256], sizes = [8, 128], strides = [1, 1]} : vector<8x384xf32> to vector<8x128xf32>
    %31 = vector.extract_strided_slice %13 {offsets = [0, 256], sizes = [8, 128], strides = [1, 1]} : vector<8x384xf32> to vector<8x128xf32>
    %32 = arith.mulf %21, %31 : vector<8x128xf32>
    %33 = arith.addf %30, %32 : vector<8x128xf32>
    %34 = math.tanh %33 : vector<8x128xf32>
    %cst_11 = arith.constant 1.000000e+00 : f32
    %35 = vector.broadcast %cst_11 : f32 to vector<8x128xf32>
    %36 = arith.subf %35, %29 : vector<8x128xf32>
    %37 = arith.mulf %36, %34 : vector<8x128xf32>
    %38 = arith.mulf %29, %10 : vector<8x128xf32>
    %39 = arith.addf %37, %38 : vector<8x128xf32>
    %c0_12 = arith.constant 0 : index
    %c0_13 = arith.constant 0 : index
    %40 = vector.load %arg6[%c0_12, %c0_13] : memref<8x128xf32, #tpu.memory_space<vmem>>, vector<8x128xf32>
    tpu.vector_store %arg6[%c0_12, %c0_13], %39 {strides = array<i32>} : memref<8x128xf32, #tpu.memory_space<vmem>>, vector<8x128xf32>,
    %41 = arith.index_cast %c0_i32_4 : i32 to index
    %c0_14 = arith.constant 0 : index
    %c0_15 = arith.constant 0 : index
    %42 = vector.load %arg5[%41, %c0_14, %c0_15] : memref<8x8x128xf32, #tpu.memory_space<vmem>>, vector<1x8x128xf32>
    %43 = vector.shape_cast %42 : vector<1x8x128xf32> to vector<8x128xf32>
    %44 = vector.shape_cast %39 : vector<8x128xf32> to vector<1x8x128xf32>
    tpu.vector_store %arg5[%41, %c0_14, %c0_15], %44 {strides = array<i32>} : memref<8x8x128xf32, #tpu.memory_space<vmem>>, vector<1x8x128xf32>,
    %c1_i32 = arith.constant 1 : i32
    %45 = arith.index_cast %c1_i32 : i32 to index
    %c0_16 = arith.constant 0 : index
    %c0_17 = arith.constant 0 : index
    %46 = vector.load %arg2[%45, %c0_16, %c0_17] : memref<8x8x384xf32, #tpu.memory_space<vmem>>, vector<1x8x384xf32>
    %47 = vector.shape_cast %46 : vector<1x8x384xf32> to vector<8x384xf32>
    %c0_18 = arith.constant 0 : index
    %c0_19 = arith.constant 0 : index
    %48 = vector.load %arg6[%c0_18, %c0_19] : memref<8x128xf32, #tpu.memory_space<vmem>>, vector<8x128xf32>
    %49 = arith.truncf %48 : vector<8x128xf32> to vector<8x128xbf16>
    %cst_20 = arith.constant dense<0.000000e+00> : vector<8x384xf32>
    %50 = tpu.matmul %49, %3, %cst_20 {dimension_numbers = #tpu.dot_dimension_numbers<[1], [0], [0], [1], [0, 0, 1, 1], [], []>} : vector<8x128xbf16>, vector<128x384xbf16>, vector<8x384xf32> -> vector<8x384xf32>
    %51 = arith.addf %50, %6 : vector<8x384xf32>
    %52 = vector.extract_strided_slice %47 {offsets = [0, 0], sizes = [8, 128], strides = [1, 1]} : vector<8x384xf32> to vector<8x128xf32>
    %53 = vector.extract_strided_slice %51 {offsets = [0, 0], sizes = [8, 128], strides = [1, 1]} : vector<8x384xf32> to vector<8x128xf32>
    %54 = arith.addf %52, %53 : vector<8x128xf32>
    %55 = arith.negf %54 : vector<8x128xf32>
    %56 = math.exp %55 : vector<8x128xf32>
    %cst_21 = arith.constant 1.000000e+00 : f32
    %57 = vector.broadcast %cst_21 : f32 to vector<8x128xf32>
    %58 = arith.addf %57, %56 : vector<8x128xf32>
    %59 = arith.divf %57, %58 : vector<8x128xf32>
    %60 = vector.extract_strided_slice %47 {offsets = [0, 128], sizes = [8, 128], strides = [1, 1]} : vector<8x384xf32> to vector<8x128xf32>
    %61 = vector.extract_strided_slice %51 {offsets = [0, 128], sizes = [8, 128], strides = [1, 1]} : vector<8x384xf32> to vector<8x128xf32>
    %62 = arith.addf %60, %61 : vector<8x128xf32>
    %63 = arith.negf %62 : vector<8x128xf32>
    %64 = math.exp %63 : vector<8x128xf32>
    %cst_22 = arith.constant 1.000000e+00 : f32
    %65 = vector.broadcast %cst_22 : f32 to vector<8x128xf32>
    %66 = arith.addf %65, %64 : vector<8x128xf32>
    %67 = arith.divf %65, %66 : vector<8x128xf32>
    %68 = vector.extract_strided_slice %47 {offsets = [0, 256], sizes = [8, 128], strides = [1, 1]} : vector<8x384xf32> to vector<8x128xf32>
    %69 = vector.extract_strided_slice %51 {offsets = [0, 256], sizes = [8, 128], strides = [1, 1]} : vector<8x384xf32> to vector<8x128xf32>
    %70 = arith.mulf %59, %69 : vector<8x128xf32>
    %71 = arith.addf %68, %70 : vector<8x128xf32>
    %72 = math.tanh %71 : vector<8x128xf32>
    %cst_23 = arith.constant 1.000000e+00 : f32
    %73 = vector.broadcast %cst_23 : f32 to vector<8x128xf32>
    %74 = arith.subf %73, %67 : vector<8x128xf32>
    %75 = arith.mulf %74, %72 : vector<8x128xf32>
    %76 = arith.mulf %67, %48 : vector<8x128xf32>
    %77 = arith.addf %75, %76 : vector<8x128xf32>
    %c0_24 = arith.constant 0 : index
    %c0_25 = arith.constant 0 : index
    %78 = vector.load %arg6[%c0_24, %c0_25] : memref<8x128xf32, #tpu.memory_space<vmem>>, vector<8x128xf32>
    tpu.vector_store %arg6[%c0_24, %c0_25], %77 {strides = array<i32>} : memref<8x128xf32, #tpu.memory_space<vmem>>, vector<8x128xf32>,
    %79 = arith.index_cast %c1_i32 : i32 to index
    %c0_26 = arith.constant 0 : index
    %c0_27 = arith.constant 0 : index
    %80 = vector.load %arg5[%79, %c0_26, %c0_27] : memref<8x8x128xf32, #tpu.memory_space<vmem>>, vector<1x8x128xf32>
    %81 = vector.shape_cast %80 : vector<1x8x128xf32> to vector<8x128xf32>
    %82 = vector.shape_cast %77 : vector<8x128xf32> to vector<1x8x128xf32>
    tpu.vector_store %arg5[%79, %c0_26, %c0_27], %82 {strides = array<i32>} : memref<8x8x128xf32, #tpu.memory_space<vmem>>, vector<1x8x128xf32>,
    %c2_i32 = arith.constant 2 : i32
    %83 = arith.index_cast %c2_i32 : i32 to index
    %c0_28 = arith.constant 0 : index
    %c0_29 = arith.constant 0 : index
    %84 = vector.load %arg2[%83, %c0_28, %c0_29] : memref<8x8x384xf32, #tpu.memory_space<vmem>>, vector<1x8x384xf32>
    %85 = vector.shape_cast %84 : vector<1x8x384xf32> to vector<8x384xf32>
    %c0_30 = arith.constant 0 : index
    %c0_31 = arith.constant 0 : index
    %86 = vector.load %arg6[%c0_30, %c0_31] : memref<8x128xf32, #tpu.memory_space<vmem>>, vector<8x128xf32>
    %87 = arith.truncf %86 : vector<8x128xf32> to vector<8x128xbf16>
    %cst_32 = arith.constant dense<0.000000e+00> : vector<8x384xf32>
    %88 = tpu.matmul %87, %3, %cst_32 {dimension_numbers = #tpu.dot_dimension_numbers<[1], [0], [0], [1], [0, 0, 1, 1], [], []>} : vector<8x128xbf16>, vector<128x384xbf16>, vector<8x384xf32> -> vector<8x384xf32>
    %89 = arith.addf %88, %6 : vector<8x384xf32>
    %90 = vector.extract_strided_slice %85 {offsets = [0, 0], sizes = [8, 128], strides = [1, 1]} : vector<8x384xf32> to vector<8x128xf32>
    %91 = vector.extract_strided_slice %89 {offsets = [0, 0], sizes = [8, 128], strides = [1, 1]} : vector<8x384xf32> to vector<8x128xf32>
    %92 = arith.addf %90, %91 : vector<8x128xf32>
    %93 = arith.negf %92 : vector<8x128xf32>
    %94 = math.exp %93 : vector<8x128xf32>
    %cst_33 = arith.constant 1.000000e+00 : f32
    %95 = vector.broadcast %cst_33 : f32 to vector<8x128xf32>
    %96 = arith.addf %95, %94 : vector<8x128xf32>
    %97 = arith.divf %95, %96 : vector<8x128xf32>
    %98 = vector.extract_strided_slice %85 {offsets = [0, 128], sizes = [8, 128], strides = [1, 1]} : vector<8x384xf32> to vector<8x128xf32>
    %99 = vector.extract_strided_slice %89 {offsets = [0, 128], sizes = [8, 128], strides = [1, 1]} : vector<8x384xf32> to vector<8x128xf32>
    %100 = arith.addf %98, %99 : vector<8x128xf32>
    %101 = arith.negf %100 : vector<8x128xf32>
    %102 = math.exp %101 : vector<8x128xf32>
    %cst_34 = arith.constant 1.000000e+00 : f32
    %103 = vector.broadcast %cst_34 : f32 to vector<8x128xf32>
    %104 = arith.addf %103, %102 : vector<8x128xf32>
    %105 = arith.divf %103, %104 : vector<8x128xf32>
    %106 = vector.extract_strided_slice %85 {offsets = [0, 256], sizes = [8, 128], strides = [1, 1]} : vector<8x384xf32> to vector<8x128xf32>
    %107 = vector.extract_strided_slice %89 {offsets = [0, 256], sizes = [8, 128], strides = [1, 1]} : vector<8x384xf32> to vector<8x128xf32>
    %108 = arith.mulf %97, %107 : vector<8x128xf32>
    %109 = arith.addf %106, %108 : vector<8x128xf32>
    %110 = math.tanh %109 : vector<8x128xf32>
    %cst_35 = arith.constant 1.000000e+00 : f32
    %111 = vector.broadcast %cst_35 : f32 to vector<8x128xf32>
    %112 = arith.subf %111, %105 : vector<8x128xf32>
    %113 = arith.mulf %112, %110 : vector<8x128xf32>
    %114 = arith.mulf %105, %86 : vector<8x128xf32>
    %115 = arith.addf %113, %114 : vector<8x128xf32>
    %c0_36 = arith.constant 0 : index
    %c0_37 = arith.constant 0 : index
    %116 = vector.load %arg6[%c0_36, %c0_37] : memref<8x128xf32, #tpu.memory_space<vmem>>, vector<8x128xf32>
    tpu.vector_store %arg6[%c0_36, %c0_37], %115 {strides = array<i32>} : memref<8x128xf32, #tpu.memory_space<vmem>>, vector<8x128xf32>,
    %117 = arith.index_cast %c2_i32 : i32 to index
    %c0_38 = arith.constant 0 : index
    %c0_39 = arith.constant 0 : index
    %118 = vector.load %arg5[%117, %c0_38, %c0_39] : memref<8x8x128xf32, #tpu.memory_space<vmem>>, vector<1x8x128xf32>
    %119 = vector.shape_cast %118 : vector<1x8x128xf32> to vector<8x128xf32>
    %120 = vector.shape_cast %115 : vector<8x128xf32> to vector<1x8x128xf32>
    tpu.vector_store %arg5[%117, %c0_38, %c0_39], %120 {strides = array<i32>} : memref<8x8x128xf32, #tpu.memory_space<vmem>>, vector<1x8x128xf32>,
    %c3_i32 = arith.constant 3 : i32
    %121 = arith.index_cast %c3_i32 : i32 to index
    %c0_40 = arith.constant 0 : index
    %c0_41 = arith.constant 0 : index
    %122 = vector.load %arg2[%121, %c0_40, %c0_41] : memref<8x8x384xf32, #tpu.memory_space<vmem>>, vector<1x8x384xf32>
    %123 = vector.shape_cast %122 : vector<1x8x384xf32> to vector<8x384xf32>
    %c0_42 = arith.constant 0 : index
    %c0_43 = arith.constant 0 : index
    %124 = vector.load %arg6[%c0_42, %c0_43] : memref<8x128xf32, #tpu.memory_space<vmem>>, vector<8x128xf32>
    %125 = arith.truncf %124 : vector<8x128xf32> to vector<8x128xbf16>
    %cst_44 = arith.constant dense<0.000000e+00> : vector<8x384xf32>
    %126 = tpu.matmul %125, %3, %cst_44 {dimension_numbers = #tpu.dot_dimension_numbers<[1], [0], [0], [1], [0, 0, 1, 1], [], []>} : vector<8x128xbf16>, vector<128x384xbf16>, vector<8x384xf32> -> vector<8x384xf32>
    %127 = arith.addf %126, %6 : vector<8x384xf32>
    %128 = vector.extract_strided_slice %123 {offsets = [0, 0], sizes = [8, 128], strides = [1, 1]} : vector<8x384xf32> to vector<8x128xf32>
    %129 = vector.extract_strided_slice %127 {offsets = [0, 0], sizes = [8, 128], strides = [1, 1]} : vector<8x384xf32> to vector<8x128xf32>
    %130 = arith.addf %128, %129 : vector<8x128xf32>
    %131 = arith.negf %130 : vector<8x128xf32>
    %132 = math.exp %131 : vector<8x128xf32>
    %cst_45 = arith.constant 1.000000e+00 : f32
    %133 = vector.broadcast %cst_45 : f32 to vector<8x128xf32>
    %134 = arith.addf %133, %132 : vector<8x128xf32>
    %135 = arith.divf %133, %134 : vector<8x128xf32>
    %136 = vector.extract_strided_slice %123 {offsets = [0, 128], sizes = [8, 128], strides = [1, 1]} : vector<8x384xf32> to vector<8x128xf32>
    %137 = vector.extract_strided_slice %127 {offsets = [0, 128], sizes = [8, 128], strides = [1, 1]} : vector<8x384xf32> to vector<8x128xf32>
    %138 = arith.addf %136, %137 : vector<8x128xf32>
    %139 = arith.negf %138 : vector<8x128xf32>
    %140 = math.exp %139 : vector<8x128xf32>
    %cst_46 = arith.constant 1.000000e+00 : f32
    %141 = vector.broadcast %cst_46 : f32 to vector<8x128xf32>
    %142 = arith.addf %141, %140 : vector<8x128xf32>
    %143 = arith.divf %141, %142 : vector<8x128xf32>
    %144 = vector.extract_strided_slice %123 {offsets = [0, 256], sizes = [8, 128], strides = [1, 1]} : vector<8x384xf32> to vector<8x128xf32>
    %145 = vector.extract_strided_slice %127 {offsets = [0, 256], sizes = [8, 128], strides = [1, 1]} : vector<8x384xf32> to vector<8x128xf32>
    %146 = arith.mulf %135, %145 : vector<8x128xf32>
    %147 = arith.addf %144, %146 : vector<8x128xf32>
    %148 = math.tanh %147 : vector<8x128xf32>
    %cst_47 = arith.constant 1.000000e+00 : f32
    %149 = vector.broadcast %cst_47 : f32 to vector<8x128xf32>
    %150 = arith.subf %149, %143 : vector<8x128xf32>
    %151 = arith.mulf %150, %148 : vector<8x128xf32>
    %152 = arith.mulf %143, %124 : vector<8x128xf32>
    %153 = arith.addf %151, %152 : vector<8x128xf32>
    %c0_48 = arith.constant 0 : index
    %c0_49 = arith.constant 0 : index
    %154 = vector.load %arg6[%c0_48, %c0_49] : memref<8x128xf32, #tpu.memory_space<vmem>>, vector<8x128xf32>
    tpu.vector_store %arg6[%c0_48, %c0_49], %153 {strides = array<i32>} : memref<8x128xf32, #tpu.memory_space<vmem>>, vector<8x128xf32>,
    %155 = arith.index_cast %c3_i32 : i32 to index
    %c0_50 = arith.constant 0 : index
    %c0_51 = arith.constant 0 : index
    %156 = vector.load %arg5[%155, %c0_50, %c0_51] : memref<8x8x128xf32, #tpu.memory_space<vmem>>, vector<1x8x128xf32>
    %157 = vector.shape_cast %156 : vector<1x8x128xf32> to vector<8x128xf32>
    %158 = vector.shape_cast %153 : vector<8x128xf32> to vector<1x8x128xf32>
    tpu.vector_store %arg5[%155, %c0_50, %c0_51], %158 {strides = array<i32>} : memref<8x8x128xf32, #tpu.memory_space<vmem>>, vector<1x8x128xf32>,
    %c4_i32 = arith.constant 4 : i32
    %159 = arith.index_cast %c4_i32 : i32 to index
    %c0_52 = arith.constant 0 : index
    %c0_53 = arith.constant 0 : index
    %160 = vector.load %arg2[%159, %c0_52, %c0_53] : memref<8x8x384xf32, #tpu.memory_space<vmem>>, vector<1x8x384xf32>
    %161 = vector.shape_cast %160 : vector<1x8x384xf32> to vector<8x384xf32>
    %c0_54 = arith.constant 0 : index
    %c0_55 = arith.constant 0 : index
    %162 = vector.load %arg6[%c0_54, %c0_55] : memref<8x128xf32, #tpu.memory_space<vmem>>, vector<8x128xf32>
    %163 = arith.truncf %162 : vector<8x128xf32> to vector<8x128xbf16>
    %cst_56 = arith.constant dense<0.000000e+00> : vector<8x384xf32>
    %164 = tpu.matmul %163, %3, %cst_56 {dimension_numbers = #tpu.dot_dimension_numbers<[1], [0], [0], [1], [0, 0, 1, 1], [], []>} : vector<8x128xbf16>, vector<128x384xbf16>, vector<8x384xf32> -> vector<8x384xf32>
    %165 = arith.addf %164, %6 : vector<8x384xf32>
    %166 = vector.extract_strided_slice %161 {offsets = [0, 0], sizes = [8, 128], strides = [1, 1]} : vector<8x384xf32> to vector<8x128xf32>
    %167 = vector.extract_strided_slice %165 {offsets = [0, 0], sizes = [8, 128], strides = [1, 1]} : vector<8x384xf32> to vector<8x128xf32>
    %168 = arith.addf %166, %167 : vector<8x128xf32>
    %169 = arith.negf %168 : vector<8x128xf32>
    %170 = math.exp %169 : vector<8x128xf32>
    %cst_57 = arith.constant 1.000000e+00 : f32
    %171 = vector.broadcast %cst_57 : f32 to vector<8x128xf32>
    %172 = arith.addf %171, %170 : vector<8x128xf32>
    %173 = arith.divf %171, %172 : vector<8x128xf32>
    %174 = vector.extract_strided_slice %161 {offsets = [0, 128], sizes = [8, 128], strides = [1, 1]} : vector<8x384xf32> to vector<8x128xf32>
    %175 = vector.extract_strided_slice %165 {offsets = [0, 128], sizes = [8, 128], strides = [1, 1]} : vector<8x384xf32> to vector<8x128xf32>
    %176 = arith.addf %174, %175 : vector<8x128xf32>
    %177 = arith.negf %176 : vector<8x128xf32>
    %178 = math.exp %177 : vector<8x128xf32>
    %cst_58 = arith.constant 1.000000e+00 : f32
    %179 = vector.broadcast %cst_58 : f32 to vector<8x128xf32>
    %180 = arith.addf %179, %178 : vector<8x128xf32>
    %181 = arith.divf %179, %180 : vector<8x128xf32>
    %182 = vector.extract_strided_slice %161 {offsets = [0, 256], sizes = [8, 128], strides = [1, 1]} : vector<8x384xf32> to vector<8x128xf32>
    %183 = vector.extract_strided_slice %165 {offsets = [0, 256], sizes = [8, 128], strides = [1, 1]} : vector<8x384xf32> to vector<8x128xf32>
    %184 = arith.mulf %173, %183 : vector<8x128xf32>
    %185 = arith.addf %182, %184 : vector<8x128xf32>
    %186 = math.tanh %185 : vector<8x128xf32>
    %cst_59 = arith.constant 1.000000e+00 : f32
    %187 = vector.broadcast %cst_59 : f32 to vector<8x128xf32>
    %188 = arith.subf %187, %181 : vector<8x128xf32>
    %189 = arith.mulf %188, %186 : vector<8x128xf32>
    %190 = arith.mulf %181, %162 : vector<8x128xf32>
    %191 = arith.addf %189, %190 : vector<8x128xf32>
    %c0_60 = arith.constant 0 : index
    %c0_61 = arith.constant 0 : index
    %192 = vector.load %arg6[%c0_60, %c0_61] : memref<8x128xf32, #tpu.memory_space<vmem>>, vector<8x128xf32>
    tpu.vector_store %arg6[%c0_60, %c0_61], %191 {strides = array<i32>} : memref<8x128xf32, #tpu.memory_space<vmem>>, vector<8x128xf32>,
    %193 = arith.index_cast %c4_i32 : i32 to index
    %c0_62 = arith.constant 0 : index
    %c0_63 = arith.constant 0 : index
    %194 = vector.load %arg5[%193, %c0_62, %c0_63] : memref<8x8x128xf32, #tpu.memory_space<vmem>>, vector<1x8x128xf32>
    %195 = vector.shape_cast %194 : vector<1x8x128xf32> to vector<8x128xf32>
    %196 = vector.shape_cast %191 : vector<8x128xf32> to vector<1x8x128xf32>
    tpu.vector_store %arg5[%193, %c0_62, %c0_63], %196 {strides = array<i32>} : memref<8x8x128xf32, #tpu.memory_space<vmem>>, vector<1x8x128xf32>,
    %c5_i32 = arith.constant 5 : i32
    %197 = arith.index_cast %c5_i32 : i32 to index
    %c0_64 = arith.constant 0 : index
    %c0_65 = arith.constant 0 : index
    %198 = vector.load %arg2[%197, %c0_64, %c0_65] : memref<8x8x384xf32, #tpu.memory_space<vmem>>, vector<1x8x384xf32>
    %199 = vector.shape_cast %198 : vector<1x8x384xf32> to vector<8x384xf32>
    %c0_66 = arith.constant 0 : index
    %c0_67 = arith.constant 0 : index
    %200 = vector.load %arg6[%c0_66, %c0_67] : memref<8x128xf32, #tpu.memory_space<vmem>>, vector<8x128xf32>
    %201 = arith.truncf %200 : vector<8x128xf32> to vector<8x128xbf16>
    %cst_68 = arith.constant dense<0.000000e+00> : vector<8x384xf32>
    %202 = tpu.matmul %201, %3, %cst_68 {dimension_numbers = #tpu.dot_dimension_numbers<[1], [0], [0], [1], [0, 0, 1, 1], [], []>} : vector<8x128xbf16>, vector<128x384xbf16>, vector<8x384xf32> -> vector<8x384xf32>
    %203 = arith.addf %202, %6 : vector<8x384xf32>
    %204 = vector.extract_strided_slice %199 {offsets = [0, 0], sizes = [8, 128], strides = [1, 1]} : vector<8x384xf32> to vector<8x128xf32>
    %205 = vector.extract_strided_slice %203 {offsets = [0, 0], sizes = [8, 128], strides = [1, 1]} : vector<8x384xf32> to vector<8x128xf32>
    %206 = arith.addf %204, %205 : vector<8x128xf32>
    %207 = arith.negf %206 : vector<8x128xf32>
    %208 = math.exp %207 : vector<8x128xf32>
    %cst_69 = arith.constant 1.000000e+00 : f32
    %209 = vector.broadcast %cst_69 : f32 to vector<8x128xf32>
    %210 = arith.addf %209, %208 : vector<8x128xf32>
    %211 = arith.divf %209, %210 : vector<8x128xf32>
    %212 = vector.extract_strided_slice %199 {offsets = [0, 128], sizes = [8, 128], strides = [1, 1]} : vector<8x384xf32> to vector<8x128xf32>
    %213 = vector.extract_strided_slice %203 {offsets = [0, 128], sizes = [8, 128], strides = [1, 1]} : vector<8x384xf32> to vector<8x128xf32>
    %214 = arith.addf %212, %213 : vector<8x128xf32>
    %215 = arith.negf %214 : vector<8x128xf32>
    %216 = math.exp %215 : vector<8x128xf32>
    %cst_70 = arith.constant 1.000000e+00 : f32
    %217 = vector.broadcast %cst_70 : f32 to vector<8x128xf32>
    %218 = arith.addf %217, %216 : vector<8x128xf32>
    %219 = arith.divf %217, %218 : vector<8x128xf32>
    %220 = vector.extract_strided_slice %199 {offsets = [0, 256], sizes = [8, 128], strides = [1, 1]} : vector<8x384xf32> to vector<8x128xf32>
    %221 = vector.extract_strided_slice %203 {offsets = [0, 256], sizes = [8, 128], strides = [1, 1]} : vector<8x384xf32> to vector<8x128xf32>
    %222 = arith.mulf %211, %221 : vector<8x128xf32>
    %223 = arith.addf %220, %222 : vector<8x128xf32>
    %224 = math.tanh %223 : vector<8x128xf32>
    %cst_71 = arith.constant 1.000000e+00 : f32
    %225 = vector.broadcast %cst_71 : f32 to vector<8x128xf32>
    %226 = arith.subf %225, %219 : vector<8x128xf32>
    %227 = arith.mulf %226, %224 : vector<8x128xf32>
    %228 = arith.mulf %219, %200 : vector<8x128xf32>
    %229 = arith.addf %227, %228 : vector<8x128xf32>
    %c0_72 = arith.constant 0 : index
    %c0_73 = arith.constant 0 : index
    %230 = vector.load %arg6[%c0_72, %c0_73] : memref<8x128xf32, #tpu.memory_space<vmem>>, vector<8x128xf32>
    tpu.vector_store %arg6[%c0_72, %c0_73], %229 {strides = array<i32>} : memref<8x128xf32, #tpu.memory_space<vmem>>, vector<8x128xf32>,
    %231 = arith.index_cast %c5_i32 : i32 to index
    %c0_74 = arith.constant 0 : index
    %c0_75 = arith.constant 0 : index
    %232 = vector.load %arg5[%231, %c0_74, %c0_75] : memref<8x8x128xf32, #tpu.memory_space<vmem>>, vector<1x8x128xf32>
    %233 = vector.shape_cast %232 : vector<1x8x128xf32> to vector<8x128xf32>
    %234 = vector.shape_cast %229 : vector<8x128xf32> to vector<1x8x128xf32>
    tpu.vector_store %arg5[%231, %c0_74, %c0_75], %234 {strides = array<i32>} : memref<8x8x128xf32, #tpu.memory_space<vmem>>, vector<1x8x128xf32>,
    %c6_i32 = arith.constant 6 : i32
    %235 = arith.index_cast %c6_i32 : i32 to index
    %c0_76 = arith.constant 0 : index
    %c0_77 = arith.constant 0 : index
    %236 = vector.load %arg2[%235, %c0_76, %c0_77] : memref<8x8x384xf32, #tpu.memory_space<vmem>>, vector<1x8x384xf32>
    %237 = vector.shape_cast %236 : vector<1x8x384xf32> to vector<8x384xf32>
    %c0_78 = arith.constant 0 : index
    %c0_79 = arith.constant 0 : index
    %238 = vector.load %arg6[%c0_78, %c0_79] : memref<8x128xf32, #tpu.memory_space<vmem>>, vector<8x128xf32>
    %239 = arith.truncf %238 : vector<8x128xf32> to vector<8x128xbf16>
    %cst_80 = arith.constant dense<0.000000e+00> : vector<8x384xf32>
    %240 = tpu.matmul %239, %3, %cst_80 {dimension_numbers = #tpu.dot_dimension_numbers<[1], [0], [0], [1], [0, 0, 1, 1], [], []>} : vector<8x128xbf16>, vector<128x384xbf16>, vector<8x384xf32> -> vector<8x384xf32>
    %241 = arith.addf %240, %6 : vector<8x384xf32>
    %242 = vector.extract_strided_slice %237 {offsets = [0, 0], sizes = [8, 128], strides = [1, 1]} : vector<8x384xf32> to vector<8x128xf32>
    %243 = vector.extract_strided_slice %241 {offsets = [0, 0], sizes = [8, 128], strides = [1, 1]} : vector<8x384xf32> to vector<8x128xf32>
    %244 = arith.addf %242, %243 : vector<8x128xf32>
    %245 = arith.negf %244 : vector<8x128xf32>
    %246 = math.exp %245 : vector<8x128xf32>
    %cst_81 = arith.constant 1.000000e+00 : f32
    %247 = vector.broadcast %cst_81 : f32 to vector<8x128xf32>
    %248 = arith.addf %247, %246 : vector<8x128xf32>
    %249 = arith.divf %247, %248 : vector<8x128xf32>
    %250 = vector.extract_strided_slice %237 {offsets = [0, 128], sizes = [8, 128], strides = [1, 1]} : vector<8x384xf32> to vector<8x128xf32>
    %251 = vector.extract_strided_slice %241 {offsets = [0, 128], sizes = [8, 128], strides = [1, 1]} : vector<8x384xf32> to vector<8x128xf32>
    %252 = arith.addf %250, %251 : vector<8x128xf32>
    %253 = arith.negf %252 : vector<8x128xf32>
    %254 = math.exp %253 : vector<8x128xf32>
    %cst_82 = arith.constant 1.000000e+00 : f32
    %255 = vector.broadcast %cst_82 : f32 to vector<8x128xf32>
    %256 = arith.addf %255, %254 : vector<8x128xf32>
    %257 = arith.divf %255, %256 : vector<8x128xf32>
    %258 = vector.extract_strided_slice %237 {offsets = [0, 256], sizes = [8, 128], strides = [1, 1]} : vector<8x384xf32> to vector<8x128xf32>
    %259 = vector.extract_strided_slice %241 {offsets = [0, 256], sizes = [8, 128], strides = [1, 1]} : vector<8x384xf32> to vector<8x128xf32>
    %260 = arith.mulf %249, %259 : vector<8x128xf32>
    %261 = arith.addf %258, %260 : vector<8x128xf32>
    %262 = math.tanh %261 : vector<8x128xf32>
    %cst_83 = arith.constant 1.000000e+00 : f32
    %263 = vector.broadcast %cst_83 : f32 to vector<8x128xf32>
    %264 = arith.subf %263, %257 : vector<8x128xf32>
    %265 = arith.mulf %264, %262 : vector<8x128xf32>
    %266 = arith.mulf %257, %238 : vector<8x128xf32>
    %267 = arith.addf %265, %266 : vector<8x128xf32>
    %c0_84 = arith.constant 0 : index
    %c0_85 = arith.constant 0 : index
    %268 = vector.load %arg6[%c0_84, %c0_85] : memref<8x128xf32, #tpu.memory_space<vmem>>, vector<8x128xf32>
    tpu.vector_store %arg6[%c0_84, %c0_85], %267 {strides = array<i32>} : memref<8x128xf32, #tpu.memory_space<vmem>>, vector<8x128xf32>,
    %269 = arith.index_cast %c6_i32 : i32 to index
    %c0_86 = arith.constant 0 : index
    %c0_87 = arith.constant 0 : index
    %270 = vector.load %arg5[%269, %c0_86, %c0_87] : memref<8x8x128xf32, #tpu.memory_space<vmem>>, vector<1x8x128xf32>
    %271 = vector.shape_cast %270 : vector<1x8x128xf32> to vector<8x128xf32>
    %272 = vector.shape_cast %267 : vector<8x128xf32> to vector<1x8x128xf32>
    tpu.vector_store %arg5[%269, %c0_86, %c0_87], %272 {strides = array<i32>} : memref<8x8x128xf32, #tpu.memory_space<vmem>>, vector<1x8x128xf32>,
    %c7_i32 = arith.constant 7 : i32
    %273 = arith.index_cast %c7_i32 : i32 to index
    %c0_88 = arith.constant 0 : index
    %c0_89 = arith.constant 0 : index
    %274 = vector.load %arg2[%273, %c0_88, %c0_89] : memref<8x8x384xf32, #tpu.memory_space<vmem>>, vector<1x8x384xf32>
    %275 = vector.shape_cast %274 : vector<1x8x384xf32> to vector<8x384xf32>
    %c0_90 = arith.constant 0 : index
    %c0_91 = arith.constant 0 : index
    %276 = vector.load %arg6[%c0_90, %c0_91] : memref<8x128xf32, #tpu.memory_space<vmem>>, vector<8x128xf32>
    %277 = arith.truncf %276 : vector<8x128xf32> to vector<8x128xbf16>
    %cst_92 = arith.constant dense<0.000000e+00> : vector<8x384xf32>
    %278 = tpu.matmul %277, %3, %cst_92 {dimension_numbers = #tpu.dot_dimension_numbers<[1], [0], [0], [1], [0, 0, 1, 1], [], []>} : vector<8x128xbf16>, vector<128x384xbf16>, vector<8x384xf32> -> vector<8x384xf32>
    %279 = arith.addf %278, %6 : vector<8x384xf32>
    %280 = vector.extract_strided_slice %275 {offsets = [0, 0], sizes = [8, 128], strides = [1, 1]} : vector<8x384xf32> to vector<8x128xf32>
    %281 = vector.extract_strided_slice %279 {offsets = [0, 0], sizes = [8, 128], strides = [1, 1]} : vector<8x384xf32> to vector<8x128xf32>
    %282 = arith.addf %280, %281 : vector<8x128xf32>
    %283 = arith.negf %282 : vector<8x128xf32>
    %284 = math.exp %283 : vector<8x128xf32>
    %cst_93 = arith.constant 1.000000e+00 : f32
    %285 = vector.broadcast %cst_93 : f32 to vector<8x128xf32>
    %286 = arith.addf %285, %284 : vector<8x128xf32>
    %287 = arith.divf %285, %286 : vector<8x128xf32>
    %288 = vector.extract_strided_slice %275 {offsets = [0, 128], sizes = [8, 128], strides = [1, 1]} : vector<8x384xf32> to vector<8x128xf32>
    %289 = vector.extract_strided_slice %279 {offsets = [0, 128], sizes = [8, 128], strides = [1, 1]} : vector<8x384xf32> to vector<8x128xf32>
    %290 = arith.addf %288, %289 : vector<8x128xf32>
    %291 = arith.negf %290 : vector<8x128xf32>
    %292 = math.exp %291 : vector<8x128xf32>
    %cst_94 = arith.constant 1.000000e+00 : f32
    %293 = vector.broadcast %cst_94 : f32 to vector<8x128xf32>
    %294 = arith.addf %293, %292 : vector<8x128xf32>
    %295 = arith.divf %293, %294 : vector<8x128xf32>
    %296 = vector.extract_strided_slice %275 {offsets = [0, 256], sizes = [8, 128], strides = [1, 1]} : vector<8x384xf32> to vector<8x128xf32>
    %297 = vector.extract_strided_slice %279 {offsets = [0, 256], sizes = [8, 128], strides = [1, 1]} : vector<8x384xf32> to vector<8x128xf32>
    %298 = arith.mulf %287, %297 : vector<8x128xf32>
    %299 = arith.addf %296, %298 : vector<8x128xf32>
    %300 = math.tanh %299 : vector<8x128xf32>
    %cst_95 = arith.constant 1.000000e+00 : f32
    %301 = vector.broadcast %cst_95 : f32 to vector<8x128xf32>
    %302 = arith.subf %301, %295 : vector<8x128xf32>
    %303 = arith.mulf %302, %300 : vector<8x128xf32>
    %304 = arith.mulf %295, %276 : vector<8x128xf32>
    %305 = arith.addf %303, %304 : vector<8x128xf32>
    %c0_96 = arith.constant 0 : index
    %c0_97 = arith.constant 0 : index
    %306 = vector.load %arg6[%c0_96, %c0_97] : memref<8x128xf32, #tpu.memory_space<vmem>>, vector<8x128xf32>
    tpu.vector_store %arg6[%c0_96, %c0_97], %305 {strides = array<i32>} : memref<8x128xf32, #tpu.memory_space<vmem>>, vector<8x128xf32>,
    %307 = arith.index_cast %c7_i32 : i32 to index
    %c0_98 = arith.constant 0 : index
    %c0_99 = arith.constant 0 : index
    %308 = vector.load %arg5[%307, %c0_98, %c0_99] : memref<8x8x128xf32, #tpu.memory_space<vmem>>, vector<1x8x128xf32>
    %309 = vector.shape_cast %308 : vector<1x8x128xf32> to vector<8x128xf32>
    %310 = vector.shape_cast %305 : vector<8x128xf32> to vector<1x8x128xf32>
    tpu.vector_store %arg5[%307, %c0_98, %c0_99], %310 {strides = array<i32>} : memref<8x8x128xf32, #tpu.memory_space<vmem>>, vector<1x8x128xf32>,
    %c8_i32 = arith.constant 8 : i32
    return
  }
  func.func @transform_0(%arg0: i32, %arg1: i32) -> (i32, i32, i32) {
    %c0_i32 = arith.constant 0 : i32
    %c0_i32_0 = arith.constant 0 : i32
    return %arg1, %arg0, %c0_i32 : i32, i32, i32
  }
  func.func @transform_1(%arg0: i32, %arg1: i32) -> (i32, i32) {
    %c0_i32 = arith.constant 0 : i32
    %c0_i32_0 = arith.constant 0 : i32
    %c0_i32_1 = arith.constant 0 : i32
    return %c0_i32, %c0_i32_0 : i32, i32
  }
  func.func @transform_2(%arg0: i32, %arg1: i32) -> (i32, i32) {
    %c0_i32 = arith.constant 0 : i32
    %c0_i32_0 = arith.constant 0 : i32
    %c0_i32_1 = arith.constant 0 : i32
    return %c0_i32, %c0_i32_0 : i32, i32
  }
  func.func @transform_3(%arg0: i32, %arg1: i32) -> (i32, i32, i32) {
    %c0_i32 = arith.constant 0 : i32
    %c0_i32_0 = arith.constant 0 : i32
    return %arg1, %arg0, %c0_i32 : i32, i32, i32
  }
}

module attributes {stable_mosaic.version = 11 : i64} {
  func.func @_fc23_kernel(%arg0: i32, %arg1: memref<64x128xf32, #tpu.memory_space<vmem>>, %arg2: memref<64x15xbf16, #tpu.memory_space<vmem>>, %arg3: memref<15x128xbf16, #tpu.memory_space<vmem>>, %arg4: memref<1x128xf32, #tpu.memory_space<vmem>>, %arg5: memref<128x5xbf16, #tpu.memory_space<vmem>>, %arg6: memref<128x5xbf16, #tpu.memory_space<vmem>>, %arg7: memref<1x5xf32, #tpu.memory_space<vmem>>, %arg8: memref<64x5xf32, #tpu.memory_space<vmem>>) attributes {dimension_semantics = [#tpu.dimension_semantics<parallel>], iteration_bounds = array<i64: 1>, scalar_prefetch = 0 : i64, scratch_operands = 0 : i64, tpu.core_type = #tpu.core_type<tc>, window_params = [{transform_indices = @transform_0, window_bounds = array<i64: 64, 128>}, {transform_indices = @transform_1, window_bounds = array<i64: 64, 15>}, {pipeline_mode = #tpu.pipeline_mode<synchronous>, transform_indices = @transform_2, window_bounds = array<i64: 15, 128>}, {pipeline_mode = #tpu.pipeline_mode<synchronous>, transform_indices = @transform_3, window_bounds = array<i64: 1, 128>}, {pipeline_mode = #tpu.pipeline_mode<synchronous>, transform_indices = @transform_4, window_bounds = array<i64: 128, 5>}, {pipeline_mode = #tpu.pipeline_mode<synchronous>, transform_indices = @transform_5, window_bounds = array<i64: 128, 5>}, {pipeline_mode = #tpu.pipeline_mode<synchronous>, transform_indices = @transform_6, window_bounds = array<i64: 1, 5>}, {transform_indices = @transform_7, window_bounds = array<i64: 64, 5>}]} {
    %c0 = arith.constant 0 : index
    %c0_0 = arith.constant 0 : index
    %0 = vector.load %arg2[%c0, %c0_0] : memref<64x15xbf16, #tpu.memory_space<vmem>>, vector<64x15xbf16>
    %c0_1 = arith.constant 0 : index
    %c0_2 = arith.constant 0 : index
    %1 = vector.load %arg3[%c0_1, %c0_2] : memref<15x128xbf16, #tpu.memory_space<vmem>>, vector<15x128xbf16>
    %cst = arith.constant dense<0.000000e+00> : vector<64x128xf32>
    %2 = tpu.matmul %0, %1, %cst {dimension_numbers = #tpu.dot_dimension_numbers<[1], [0], [0], [1], [0, 0, 1, 1], [], []>} : vector<64x15xbf16>, vector<15x128xbf16>, vector<64x128xf32> -> vector<64x128xf32>
    %c0_3 = arith.constant 0 : index
    %c0_4 = arith.constant 0 : index
    %3 = vector.load %arg4[%c0_3, %c0_4] : memref<1x128xf32, #tpu.memory_space<vmem>>, vector<1x128xf32>
    %4 = vector.broadcast %3 : vector<1x128xf32> to vector<64x128xf32>
    %5 = arith.addf %2, %4 : vector<64x128xf32>
    %cst_5 = arith.constant 0.000000e+00 : f32
    %6 = vector.broadcast %cst_5 : f32 to vector<64x128xf32>
    %7 = arith.cmpf oge, %5, %6 : vector<64x128xf32>
    %cst_6 = arith.constant 0.00999999977 : f32
    %8 = vector.broadcast %cst_6 : f32 to vector<64x128xf32>
    %9 = arith.mulf %8, %5 : vector<64x128xf32>
    %10 = arith.select %7, %5, %9 : vector<64x128xi1>, vector<64x128xf32>
    %c0_7 = arith.constant 0 : index
    %c0_8 = arith.constant 0 : index
    %11 = vector.load %arg1[%c0_7, %c0_8] : memref<64x128xf32, #tpu.memory_space<vmem>>, vector<64x128xf32>
    %12 = arith.truncf %11 : vector<64x128xf32> to vector<64x128xbf16>
    %c0_9 = arith.constant 0 : index
    %c0_10 = arith.constant 0 : index
    %13 = vector.load %arg5[%c0_9, %c0_10] : memref<128x5xbf16, #tpu.memory_space<vmem>>, vector<128x5xbf16>
    %cst_11 = arith.constant dense<0.000000e+00> : vector<64x5xf32>
    %14 = tpu.matmul %12, %13, %cst_11 {dimension_numbers = #tpu.dot_dimension_numbers<[1], [0], [0], [1], [0, 0, 1, 1], [], []>} : vector<64x128xbf16>, vector<128x5xbf16>, vector<64x5xf32> -> vector<64x5xf32>
    %15 = arith.truncf %10 : vector<64x128xf32> to vector<64x128xbf16>
    %c0_12 = arith.constant 0 : index
    %c0_13 = arith.constant 0 : index
    %16 = vector.load %arg6[%c0_12, %c0_13] : memref<128x5xbf16, #tpu.memory_space<vmem>>, vector<128x5xbf16>
    %cst_14 = arith.constant dense<0.000000e+00> : vector<64x5xf32>
    %17 = tpu.matmul %15, %16, %cst_14 {dimension_numbers = #tpu.dot_dimension_numbers<[1], [0], [0], [1], [0, 0, 1, 1], [], []>} : vector<64x128xbf16>, vector<128x5xbf16>, vector<64x5xf32> -> vector<64x5xf32>
    %18 = arith.addf %14, %17 : vector<64x5xf32>
    %c0_15 = arith.constant 0 : index
    %c0_16 = arith.constant 0 : index
    %19 = vector.load %arg7[%c0_15, %c0_16] : memref<1x5xf32, #tpu.memory_space<vmem>>, vector<1x5xf32>
    %20 = vector.broadcast %19 : vector<1x5xf32> to vector<64x5xf32>
    %21 = arith.addf %18, %20 : vector<64x5xf32>
    %c0_17 = arith.constant 0 : index
    %c0_18 = arith.constant 0 : index
    %22 = vector.load %arg8[%c0_17, %c0_18] : memref<64x5xf32, #tpu.memory_space<vmem>>, vector<64x5xf32>
    tpu.vector_store %arg8[%c0_17, %c0_18], %21 {strides = array<i32>} : memref<64x5xf32, #tpu.memory_space<vmem>>, vector<64x5xf32>,
    return
  }
  func.func @transform_0(%arg0: i32) -> (i32, i32) {
    %c0_i32 = arith.constant 0 : i32
    %c0_i32_0 = arith.constant 0 : i32
    return %arg0, %c0_i32 : i32, i32
  }
  func.func @transform_1(%arg0: i32) -> (i32, i32) {
    %c0_i32 = arith.constant 0 : i32
    %c0_i32_0 = arith.constant 0 : i32
    return %arg0, %c0_i32 : i32, i32
  }
  func.func @transform_2(%arg0: i32) -> (i32, i32) {
    %c0_i32 = arith.constant 0 : i32
    %c0_i32_0 = arith.constant 0 : i32
    %c0_i32_1 = arith.constant 0 : i32
    return %c0_i32, %c0_i32_0 : i32, i32
  }
  func.func @transform_3(%arg0: i32) -> (i32, i32) {
    %c0_i32 = arith.constant 0 : i32
    %c0_i32_0 = arith.constant 0 : i32
    %c0_i32_1 = arith.constant 0 : i32
    return %c0_i32, %c0_i32_0 : i32, i32
  }
  func.func @transform_4(%arg0: i32) -> (i32, i32) {
    %c0_i32 = arith.constant 0 : i32
    %c0_i32_0 = arith.constant 0 : i32
    %c0_i32_1 = arith.constant 0 : i32
    return %c0_i32, %c0_i32_0 : i32, i32
  }
  func.func @transform_5(%arg0: i32) -> (i32, i32) {
    %c0_i32 = arith.constant 0 : i32
    %c0_i32_0 = arith.constant 0 : i32
    %c0_i32_1 = arith.constant 0 : i32
    return %c0_i32, %c0_i32_0 : i32, i32
  }
  func.func @transform_6(%arg0: i32) -> (i32, i32) {
    %c0_i32 = arith.constant 0 : i32
    %c0_i32_0 = arith.constant 0 : i32
    %c0_i32_1 = arith.constant 0 : i32
    return %c0_i32, %c0_i32_0 : i32, i32
  }
  func.func @transform_7(%arg0: i32) -> (i32, i32) {
    %c0_i32 = arith.constant 0 : i32
    %c0_i32_0 = arith.constant 0 : i32
    return %arg0, %c0_i32 : i32, i32
  }
}

</mosaic_0001>

<bundles_post_ra>
// kernel: mul.5
= control target key start
LH: loop header
LB: loop body
LE: loop exit
PB: predicated region body
PF: predicated region fallthrough
CT: control target
= control target key end

     0   :  { %s27_s8 = smov 10   ;;  %vm3_vm0 = vcmask 39936   ;;  %vm9_vm1 = vcmask 121936   ;;  %vm15_vm2 = vcmask 80936   ;;  %s51_s0 = inlined_call_operand.vmem [shape: f32[9,1,5], index: 0, kind: input, shape index: {}]   ;;  %s52_s1 = inlined_call_operand.vmem [shape: f32[3,15], index: 1, kind: output, shape index: {}]  }
   0x1   :  { %v23_v0 = vld [vmem:[%s51_s0 + $0x2] ss:$3 sm:$0x7]   ;;  %v2_v1 = vld [vmem:[%s51_s0] ss:$3 sm:$0x7]  }
   0x2   :  { %7 = vrot.lane.b32.xlu0 %v23_v0, %s27_s8  ;;  %v24_v2 = vld [vmem:[%s51_s0 + $0x1] ss:$3 sm:$0x7]   ;;  %4 = vst.msk [vmem:[#allocation0] sm:$0x7] %vm3_vm0, %v2_v1   ;;  %s28_s0 = smov 5  }
   0x6   :  { %13 = vrot.lane.b32.xlu0 %v24_v2, %s28_s0 }
  0x74   :  { %v8_v3 = vpop.permute.xlu0 %7  }
  0x75   :  { %10 = vst.msk [vmem:[#allocation0] sm:$0x7] %vm9_vm1, %v8_v3  }
  0x78   :  { %v14_v4 = vpop.permute.xlu0 %13  }
  0x79   :  { %16 = vst.msk [vmem:[#allocation0] sm:$0x7] %vm15_vm2, %v14_v4  }
  0x80   :  { %v20_v5 = vld [vmem:[#allocation0] sm:$0xf] }
  0x81   :  { %22 = vst [vmem:[%s52_s1] sm:$0xf] %v20_v5 }

// kernel: coma_critic_forward.3
= control target key start
LH: loop header
LB: loop body
LE: loop exit
PB: predicated region body
PF: predicated region fallthrough
CT: control target
= control target key end

     0   :  { %vm80_vm0 = vcmask 392192   ;;  %v662_v31 = vmov 0   ;;  %s888_s1 = inlined_call_operand.vmem [shape: bf16[48,128], index: 1, kind: input, shape index: {}]   ;;  %s889_s0 = inlined_call_operand.vmem [shape: bf16[64,48], index: 0, kind: input, shape index: {}]   ;;  %s890_s3 = inlined_call_operand.vmem [shape: bf16[128,384], index: 3, kind: input, shape index: {}]   ;;  %s891_s2 = inlined_call_operand.vmem [shape: f32[1,128], index: 2, kind: input, shape index: {}]   ;;  %s892_s4 = inlined_call_operand.vmem [shape: f32[1,384], index: 4, kind: input, shape index: {}]   ;;  %s893_s5 = inlined_call_operand.vmem [shape: f32[64,384], index: 5, kind: output, shape index: {}]  }
   0x1   :  { %v623_v0 = vld [vmem:[%s888_s1] sm:$0xff]   ;;  %v624_v1 = vld [vmem:[%s888_s1 + $0x8] sm:$0xff]   ;;  %v625_v3 = vld [vmem:[%s888_s1 + $0x10] sm:$0xff]   ;;  %395 = vmatprep.mubr.bf16.mxu1 %v662_v31 }
   0x2   :  { %584 = vmatprep.subr.bf16.mxu0 %v623_v0  ;;  %v626_v2 = vld [vmem:[%s889_s0] sm:$0xff]   ;;  %v627_v5 = vld [vmem:[%s889_s0 + $0x8] sm:$0xff]   ;;  %v628_v10 = vld [vmem:[%s889_s0 + $0x10] sm:$0xff]  }
   0x3   :  { %585 = vmatpush3.bf16.msra.mxu0 %v623_v0  ;;  %590 = vmatprep.mubr.msk.bf16.mxu0 %vm80_vm0, %v626_v2  ;;  %v630_v4 = vld [vmem:[%s890_s3 + $0x4] ss:$12 sps:$4 sm:$0xff]   ;;  %v632_v6 = vld [vmem:[%s890_s3] ss:$12 sps:$4 sm:$0xff]   ;;  %v633_v7 = vld [vmem:[%s890_s3 + $0x8] ss:$12 sps:$4 sm:$0xff]  }
   0x4   :  { %586 = vmatprep.subr.bf16.mxu0 %v624_v1  ;;  %363 = vmatprep.subr.bf16.mxu1 %v630_v4  ;;  %v634_v8 = vld [vmem:[%s890_s3 + $0x1c] ss:$12 sps:$4 sm:$0xff]   ;;  %v636_v9 = vld [vmem:[%s890_s3 + $0x18] ss:$12 sps:$4 sm:$0xff]   ;;  %v637_v11 = vld [vmem:[%s890_s3 + $0x20] ss:$12 sps:$4 sm:$0xff]  }
   0x5   :  { %364 = vmatpush1.bf16.msra.mxu1 %v632_v6  ;;  %v638_v12 = vld [vmem:[%s890_s3 + $0x34] ss:$12 sps:$4 sm:$0xff]   ;;  %v640_v13 = vld [vmem:[%s890_s3 + $0x30] ss:$12 sps:$4 sm:$0xff]   ;;  %v642_v14 = vld [vmem:[%s890_s3 + $0x4c] ss:$12 sps:$4 sm:$0xff]  }
   0x6   :  { %365 = vmatprep.subr.bf16.mxu1 %v634_v8  ;;  %v641_v15 = vld [vmem:[%s890_s3 + $0x38] ss:$12 sps:$4 sm:$0xff]   ;;  %v644_v17 = vld [vmem:[%s890_s3 + $0x48] ss:$12 sps:$4 sm:$0xff]   ;;  %v645_v18 = vld [vmem:[%s890_s3 + $0x50] ss:$12 sps:$4 sm:$0xff]  }
   0x7   :  { %587 = vmatpush3.bf16.msra.mxu0 %v624_v1  ;;  %v629_v16 = vld [vmem:[%s889_s0 + $0x18] sm:$0xff]   ;;  %v646_v19 = vld [vmem:[%s890_s3 + $0x64] ss:$12 sps:$4 sm:$0xff]   ;;  %v648_v20 = vld [vmem:[%s890_s3 + $0x60] ss:$12 sps:$4 sm:$0xff]  }
   0x8   :  { %588 = vmatprep.subr.bf16.mxu0 %v625_v3  ;;  %v650_v21 = vld [vmem:[%s890_s3 + $0x7c] ss:$12 sps:$4 sm:$0xff]   ;;  %v652_v23 = vld [vmem:[%s890_s3 + $0x78] ss:$12 sps:$4 sm:$0xff]   ;;  %v653_v24 = vld [vmem:[%s890_s3 + $0x80] ss:$12 sps:$4 sm:$0xff]  }
   0x9   :  { %366 = vmatpush1.bf16.msra.mxu1 %v636_v9  ;;  %v649_v22 = vld [vmem:[%s890_s3 + $0x68] ss:$12 sps:$4 sm:$0xff]   ;;  %v656_v26 = vld [vmem:[%s890_s3 + $0x90] ss:$12 sps:$4 sm:$0xff]   ;;  %v657_v27 = vld [vmem:[%s890_s3 + $0x98] ss:$12 sps:$4 sm:$0xff]  }
   0xa   :  { %367 = vmatprep.subr.bf16.mxu1 %v638_v12  ;;  %v654_v25 = vld [vmem:[%s890_s3 + $0x94] ss:$12 sps:$4 sm:$0xff]   ;;  %v658_v28 = vld [vmem:[%s890_s3 + $0xac] ss:$12 sps:$4 sm:$0xff]   ;;  %v661_v30 = vld [vmem:[%s890_s3 + $0xb0] ss:$12 sps:$4 sm:$0xff]  }
   0xb   :  { %589 = vmatpush3.bf16.msra.mxu0 %v625_v3  ;;  %v660_v29 = vld [vmem:[%s890_s3 + $0xa8] ss:$12 sps:$4 sm:$0xff]   ;;  %v529_v32 = vld [vmem:[%s891_s2] ss:$0 sm:$0xff] }
   0xc   :  { %598 = vmatprep.subr.bf16.mxu0 %v633_v7  ;;  %v218_v8 = vld [vmem:[%s892_s4] sm:$0x7] }
   0xd   :  { %368 = vmatpush1.bf16.msra.mxu1 %v640_v13 }
   0xe   :  { %591 = vmatmul.mubr.msk.bf16.vlgmr.msra.gmra.mrb[0].mxu0 %vm80_vm0, %v627_v5  ;;  %369 = vmatprep.subr.bf16.mxu1 %v642_v14  ;;  %v220_v5 = vlaneseq }
   0xf   :  { %594 = vmatprep.mubr.msk.bf16.mxu0 %vm80_vm0, %v628_v10  ;;  %599 = vmatpush3.bf16.msra.mxu0 %v633_v7 }
  0x10   :  { %600 = vmatprep.subr.bf16.mxu0 %v637_v11  ;;  %v221_v6 = vshrl.u32 %v220_v5, 7 }
  0x11   :  { %370 = vmatpush1.bf16.msra.mxu1 %v644_v17 }
  0x12   :  { %371 = vmatprep.subr.bf16.mxu1 %v646_v19  ;;  %v222_v7 = vsub.s32 0, %v221_v6  ;;  %v226_v9 = vsub.s32 1, %v221_v6  ;;  %v230_v10 = vsub.s32 2, %v221_v6 }
  0x13   :  { %601 = vmatpush3.bf16.msra.mxu0 %v637_v11 }
  0x14   :  { %602 = vmatprep.subr.bf16.mxu0 %v641_v15  ;;  %v796_v11 = vrot.slane %v218_v8, %v222_v7  ;;  %v798_v12 = vrot.slane %v218_v8, %v226_v9  ;;  %v231_v13 = vrot.slane %v218_v8, %v230_v10 }
  0x15   :  { %372 = vmatpush1.bf16.msra.mxu1 %v648_v20 }
  0x16   :  { %595 = vmatmul.mubr.msk.bf16.gmra.mrb[4].mxu0 %vm80_vm0, %v629_v16  ;;  %373 = vmatprep.subr.bf16.mxu1 %v650_v21 }
  0x17   :  { %603 = vmatpush3.bf16.msra.mxu0 %v641_v15 }
  0x18   :  { %604 = vmatprep.subr.bf16.mxu0 %v645_v18 }
  0x19   :  { %374 = vmatpush1.bf16.msra.mxu1 %v652_v23 }
  0x1a   :  { %375 = vmatprep.subr.bf16.mxu1 %v654_v25 }
  0x1b   :  { %605 = vmatpush3.bf16.msra.mxu0 %v645_v18 }
  0x1c   :  { %606 = vmatprep.subr.bf16.mxu0 %v649_v22 }
  0x1d   :  { %376 = vmatpush1.bf16.msra.mxu1 %v656_v26 }
  0x1e   :  { %377 = vmatprep.subr.bf16.mxu1 %v658_v28 }
  0x1f   :  { %607 = vmatpush3.bf16.msra.mxu0 %v649_v22 }
  0x20   :  { %608 = vmatprep.subr.bf16.mxu0 %v653_v24 }
  0x21   :  { %378 = vmatpush1.bf16.msra.mxu1 %v660_v29 }
  0x23   :  { %609 = vmatpush3.bf16.msra.mxu0 %v653_v24 }
  0x24   :  { %610 = vmatprep.subr.bf16.mxu0 %v657_v27 }
  0x27   :  { %611 = vmatpush3.bf16.msra.mxu0 %v657_v27 }
  0x28   :  { %612 = vmatprep.subr.bf16.mxu0 %v661_v30 }
  0x2b   :  { %613 = vmatpush3.bf16.msra.mxu0 %v661_v30 }
  0xe1   :  { %v592_v33 = vpop.f32.mrb[0].mxu0 }
  0xe2   :  { %v136_v34 = vadd.f32 %v592_v33, %v529_v32  ;;  %v127_v35 = vpop.f32.mrb[1].mxu0 }
  0xe3   :  { %v128_v36 = vadd.f32 %v529_v32, %v127_v35  ;;  %v593_v37 = vpop.f32.mrb[2].mxu0 }
  0xe4   :  { %v168_v38 = vmul.f32 0.01, %v136_v34  ;;  %v139_v39 = vadd.f32 %v593_v37, %v529_v32  ;;  %v130_v40 = vpop.f32.mrb[3].mxu0  ;;  %vm160_vm1 = vcmp.ge.f32.partialorder %v136_v34, 0.0 }
  0xe5   :  { %v166_v41 = vmul.f32 0.01, %v128_v36  ;;  %v131_v42 = vadd.f32 %v529_v32, %v130_v40  ;;  %vm158_vm2 = vcmp.ge.f32.partialorder %v128_v36, 0.0 }
  0xe6   :  { %vm161_vm3 = vcmp.ge.f32.partialorder %v139_v39, 0.0  ;;  %v169_v43 = vmul.f32 0.01, %v139_v39  ;;  %v176_v45 = vsel %vm160_vm1, %v136_v34, %v168_v38 }
  0xe7   :  { %vm159_vm4 = vcmp.ge.f32.partialorder %v131_v42, 0.0  ;;  %v167_v44 = vmul.f32 0.01, %v131_v42  ;;  %v174_v49 = vsel %vm158_vm2, %v128_v36, %v166_v41 }
  0xe8   :  { %v177_v46 = vsel %vm161_vm3, %v139_v39, %v169_v43 }
  0xe9   :  { %v183_v47 = vpack.c.bf16 %v177_v46, %v176_v45  ;;  %v596_v48 = vpop.f32.mrb[4].mxu0  ;;  %v175_v50 = vsel %vm159_vm4, %v131_v42, %v167_v44 }
  0xea   :  { %v152_v51 = vadd.f32 %v596_v48, %v529_v32  ;;  %v143_v52 = vpop.f32.mrb[5].mxu0  ;;  %v182_v53 = vpack.c.bf16 %v175_v50, %v174_v49 }
  0xeb   :  { %v144_v54 = vadd.f32 %v529_v32, %v143_v52  ;;  %v597_v55 = vpop.f32.mrb[6].mxu0 }
  0xec   :  { %vm164_vm5 = vcmp.ge.f32.partialorder %v152_v51, 0.0  ;;  %v172_v56 = vmul.f32 0.01, %v152_v51  ;;  %v155_v57 = vadd.f32 %v597_v55, %v529_v32  ;;  %v146_v58 = vpop.f32.mrb[7].mxu0  ;;  %396 = vmatmul.mubr.bf16.vlgmr.msra.gmra.mrb[0].mxu1 %v182_v53  ;;  %614 = vmatprep.mubr.bf16.mxu0 %v182_v53 }
  0xed   :  { %vm162_vm6 = vcmp.ge.f32.partialorder %v144_v54, 0.0  ;;  %v170_v59 = vmul.f32 0.01, %v144_v54  ;;  %v147_v60 = vadd.f32 %v529_v32, %v146_v58  ;;  %615 = vmatmul.mubr.bf16.vlgmr.msra.gmra.mrb[8].mxu0 %v183_v47  ;;  %405 = vmatprep.mubr.bf16.mxu1 %v662_v31 }
  0xee   :  { %vm165_vm7 = vcmp.ge.f32.partialorder %v155_v57, 0.0  ;;  %v173_v61 = vmul.f32 0.01, %v155_v57  ;;  %v180_v62 = vsel %vm164_vm5, %v152_v51, %v172_v56 }
  0xef   :  { %vm163_vm8 = vcmp.ge.f32.partialorder %v147_v60, 0.0  ;;  %v171_v63 = vmul.f32 0.01, %v147_v60  ;;  %v178_v0 = vsel %vm162_vm6, %v144_v54, %v170_v59 }
  0xf0   :  { %v181_v1 = vsel %vm165_vm7, %v155_v57, %v173_v61 }
  0xf1   :  { %v179_v2 = vsel %vm163_vm8, %v147_v60, %v171_v63  ;;  %v185_v3 = vpack.c.bf16 %v181_v1, %v180_v62 }
  0xf2   :  { %v184_v4 = vpack.c.bf16 %v179_v2, %v178_v0 }
  0xf4   :  { %406 = vmatmul.mubr.bf16.gmra.mrb[4].mxu1 %v183_v47  ;;  %618 = vmatprep.mubr.bf16.mxu0 %v184_v4 }
  0xf5   :  { %619 = vmatmul.mubr.bf16.gmra.mrb[12].mxu0 %v185_v3  ;;  %415 = vmatprep.mubr.bf16.mxu1 %v662_v31 }
  0xfc   :  { %416 = vmatmul.mubr.bf16.gmra.mrb[8].mxu1 %v184_v4 }
  0xfd   :  { %425 = vmatprep.mubr.bf16.mxu1 %v662_v31 }
 0x104   :  { %426 = vmatmul.mubr.bf16.gmra.mrb[12].mxu1 %v185_v3 }
 0x1bf   :  { %v397_v14 = vpop.f32.mrb[0].mxu1 }
 0x1c0   :  { %v398_v15 = vadd.f32 %v397_v14, %v796_v11  ;;  %v399_v16 = vpop.f32.mrb[1].mxu1  ;;  %v616_v17 = vpop.f32.mrb[8].mxu0 }
 0x1c1   :  { %v400_v18 = vadd.f32 %v399_v16, %v798_v12  ;;  %v479_v19 = vadd.f32 %v616_v17, %v231_v13  ;;  %v401_v20 = vpop.f32.mrb[2].mxu1  ;;  %v470_v21 = vpop.f32.mrb[9].mxu0 }
 0x1c2   :  { %501 = vst [vmem:[%s893_s5] sm:$0xff] %v398_v15  ;;  %v402_v22 = vadd.f32 %v401_v20, %v796_v11  ;;  %v471_v23 = vadd.f32 %v470_v21, %v231_v13  ;;  %v403_v24 = vpop.f32.mrb[3].mxu1  ;;  %v617_v25 = vpop.f32.mrb[10].mxu0 }
 0x1c3   :  { %502 = vst [vmem:[%s893_s5 + $0x8] sm:$0xff] %v400_v18  ;;  %509 = vst [vmem:[%s893_s5 + $0x40] sm:$0xff] %v479_v19  ;;  %v404_v26 = vadd.f32 %v403_v24, %v798_v12  ;;  %v482_v27 = vadd.f32 %v617_v25, %v231_v13  ;;  %v473_v28 = vpop.f32.mrb[11].mxu0 }
 0x1c4   :  { %504 = vst [vmem:[%s893_s5 + $0x18] sm:$0xff] %v402_v22  ;;  %503 = vst [vmem:[%s893_s5 + $0x10] sm:$0xff] %v471_v23  ;;  %v474_v29 = vadd.f32 %v473_v28, %v231_v13 }
 0x1c5   :  { %505 = vst [vmem:[%s893_s5 + $0x20] sm:$0xff] %v404_v26  ;;  %512 = vst [vmem:[%s893_s5 + $0x58] sm:$0xff] %v482_v27 }
 0x1c6   :  { %506 = vst [vmem:[%s893_s5 + $0x28] sm:$0xff] %v474_v29 }
 0x1c7   :  { %v407_v30 = vpop.f32.mrb[4].mxu1 }
 0x1c8   :  { %v408_v31 = vadd.f32 %v407_v30, %v796_v11  ;;  %v409_v32 = vpop.f32.mrb[5].mxu1  ;;  %v620_v33 = vpop.f32.mrb[12].mxu0 }
 0x1c9   :  { %v410_v34 = vadd.f32 %v409_v32, %v798_v12  ;;  %v495_v35 = vadd.f32 %v620_v33, %v231_v13  ;;  %v411_v36 = vpop.f32.mrb[6].mxu1  ;;  %v486_v37 = vpop.f32.mrb[13].mxu0 }
 0x1ca   :  { %507 = vst [vmem:[%s893_s5 + $0x30] sm:$0xff] %v408_v31  ;;  %v412_v38 = vadd.f32 %v411_v36, %v796_v11  ;;  %v487_v39 = vadd.f32 %v486_v37, %v231_v13  ;;  %v413_v40 = vpop.f32.mrb[7].mxu1  ;;  %v621_v41 = vpop.f32.mrb[14].mxu0 }
 0x1cb   :  { %508 = vst [vmem:[%s893_s5 + $0x38] sm:$0xff] %v410_v34  ;;  %521 = vst [vmem:[%s893_s5 + $0xa0] sm:$0xff] %v495_v35  ;;  %v414_v42 = vadd.f32 %v413_v40, %v798_v12  ;;  %v498_v43 = vadd.f32 %v621_v41, %v231_v13  ;;  %v489_v44 = vpop.f32.mrb[15].mxu0 }
 0x1cc   :  { %510 = vst [vmem:[%s893_s5 + $0x48] sm:$0xff] %v412_v38  ;;  %515 = vst [vmem:[%s893_s5 + $0x70] sm:$0xff] %v487_v39  ;;  %v490_v45 = vadd.f32 %v489_v44, %v231_v13 }
 0x1cd   :  { %511 = vst [vmem:[%s893_s5 + $0x50] sm:$0xff] %v414_v42  ;;  %524 = vst [vmem:[%s893_s5 + $0xb8] sm:$0xff] %v498_v43 }
 0x1ce   :  { %518 = vst [vmem:[%s893_s5 + $0x88] sm:$0xff] %v490_v45 }
 0x1cf   :  { %v417_v46 = vpop.f32.mrb[8].mxu1 }
 0x1d0   :  { %v418_v47 = vadd.f32 %v417_v46, %v796_v11  ;;  %v419_v48 = vpop.f32.mrb[9].mxu1 }
 0x1d1   :  { %v420_v49 = vadd.f32 %v419_v48, %v798_v12  ;;  %v421_v50 = vpop.f32.mrb[10].mxu1 }
 0x1d2   :  { %513 = vst [vmem:[%s893_s5 + $0x60] sm:$0xff] %v418_v47  ;;  %v422_v51 = vadd.f32 %v421_v50, %v796_v11  ;;  %v423_v52 = vpop.f32.mrb[11].mxu1 }
 0x1d3   :  { %514 = vst [vmem:[%s893_s5 + $0x68] sm:$0xff] %v420_v49  ;;  %v424_v53 = vadd.f32 %v423_v52, %v798_v12 }
 0x1d4   :  { %516 = vst [vmem:[%s893_s5 + $0x78] sm:$0xff] %v422_v51 }
 0x1d5   :  { %517 = vst [vmem:[%s893_s5 + $0x80] sm:$0xff] %v424_v53 }
 0x1d7   :  { %v427_v54 = vpop.f32.mrb[12].mxu1 }
 0x1d8   :  { %v428_v55 = vadd.f32 %v427_v54, %v796_v11  ;;  %v429_v56 = vpop.f32.mrb[13].mxu1 }
 0x1d9   :  { %v430_v57 = vadd.f32 %v429_v56, %v798_v12  ;;  %v431_v58 = vpop.f32.mrb[14].mxu1 }
 0x1da   :  { %519 = vst [vmem:[%s893_s5 + $0x90] sm:$0xff] %v428_v55  ;;  %v432_v59 = vadd.f32 %v431_v58, %v796_v11  ;;  %v433_v60 = vpop.f32.mrb[15].mxu1 }
 0x1db   :  { %520 = vst [vmem:[%s893_s5 + $0x98] sm:$0xff] %v430_v57  ;;  %v434_v61 = vadd.f32 %v433_v60, %v798_v12 }
 0x1dc   :  { %522 = vst [vmem:[%s893_s5 + $0xa8] sm:$0xff] %v432_v59 }
 0x1dd   :  { %523 = vst [vmem:[%s893_s5 + $0xb0] sm:$0xff] %v434_v61 }

// kernel: coma_critic_forward.5
= control target key start
LH: loop header
LB: loop body
LE: loop exit
PB: predicated region body
PF: predicated region fallthrough
CT: control target
= control target key end

     0   :  { %vm82_vm0 = vcmask 1046528   ;;  %vm83_vm1 = vcmask 1047552   ;;  %vm69_vm2 = vcmask 121856   ;;  %v624_v1 = vmov 65535   ;;  %s794_s2 = inlined_call_operand.vmem [shape: bf16[15,128], index: 2, kind: input, shape index: {}]   ;;  %s795_s1 = inlined_call_operand.vmem [shape: bf16[64,15], index: 1, kind: input, shape index: {}]   ;;  %s796_s4 = inlined_call_operand.vmem [shape: bf16[128,5], index: 4, kind: input, shape index: {}]   ;;  %s797_s5 = inlined_call_operand.vmem [shape: bf16[128,5], index: 5, kind: input, shape index: {}]   ;;  %s798_s0 = inlined_call_operand.vmem [shape: f32[64,128], index: 0, kind: input, shape index: {}]   ;;  %s799_s3 = inlined_call_operand.vmem [shape: f32[1,128], index: 3, kind: input, shape index: {}]   ;;  %s800_s6 = inlined_call_operand.vmem [shape: f32[1,5], index: 6, kind: input, shape index: {}]   ;;  %s801_s7 = inlined_call_operand.vmem [shape: f32[64,5], index: 7, kind: output, shape index: {}]  }
   0x1   :  { %v603_v0 = vld [vmem:[%s794_s2] sm:$0xff]   ;;  %v84_v2 = vsel %vm82_vm0, 4294967295, %v624_v1  ;;  %v605_v6 = vld [vmem:[%s795_s1 + $0x8] sm:$0xff]   ;;  %v606_v7 = vld [vmem:[%s795_s1 + $0x10] sm:$0xff]   ;;  %vm467_vm11 = vcmask 39936  }
   0x2   :  { %v85_v3 = vsel %vm83_vm1, %v84_v2, 0  ;;  %v604_v4 = vld [vmem:[%s795_s1] sm:$0xff]   ;;  %v610_v10 = vld [vmem:[%s796_s4 + $0x8] sm:$0xff]   ;;  %v612_v12 = vld [vmem:[%s796_s4 + $0x10] sm:$0xff]  }
   0x3   :  { %v87_v5 = vand.u32 %v603_v0, %v85_v3  ;;  %538 = vmatprep.mubr.msk.bf16.mxu0 %vm69_vm2, %v604_v4  ;;  %v608_v8 = vld [vmem:[%s796_s4] sm:$0xff]   ;;  %v611_v11 = vld [vmem:[%s797_s5 + $0x8] sm:$0xff]   ;;  %v613_v13 = vld [vmem:[%s797_s5 + $0x10] sm:$0xff]  }
   0x4   :  { %v609_v9 = vld [vmem:[%s797_s5] sm:$0xff]   ;;  %570 = vmatprep.subr.bf16.mxu1 %v608_v8  ;;  %v607_v14 = vld [vmem:[%s795_s1 + $0x18] sm:$0xff]   ;;  %v618_v19 = vld [vmem:[%s796_s4 + $0x28] sm:$0xff]  }
   0x5   :  { %536 = vmatprep.subr.bf16.mxu0 %v87_v5  ;;  %571 = vmatpush3.bf16.msra.mxu1 %v608_v8  ;;  %v614_v15 = vld [vmem:[%s796_s4 + $0x18] sm:$0xff]   ;;  %v616_v17 = vld [vmem:[%s796_s4 + $0x20] sm:$0xff]   ;;  %v619_v20 = vld [vmem:[%s797_s5 + $0x28] sm:$0xff]  }
   0x6   :  { %537 = vmatpush3.bf16.msra.mxu0 %v87_v5  ;;  %572 = vmatprep.subr.bf16.mxu1 %v610_v10  ;;  %v615_v16 = vld [vmem:[%s797_s5 + $0x18] sm:$0xff]   ;;  %v617_v18 = vld [vmem:[%s797_s5 + $0x20] sm:$0xff]   ;;  %v620_v21 = vld [vmem:[%s796_s4 + $0x30] sm:$0xff]  }
   0x7   :  { %546 = vmatprep.subr.bf16.mxu0 %v609_v9  ;;  %v621_v22 = vld [vmem:[%s797_s5 + $0x30] sm:$0xff]   ;;  %v622_v23 = vld [vmem:[%s796_s4 + $0x38] sm:$0xff]   ;;  %v178_v24 = vld [vmem:[%s798_s0] sm:$0xff] }
   0x8   :  { %v179_v25 = vld [vmem:[%s798_s0 + $0x8] sm:$0xff]  ;;  %v623_v26 = vld [vmem:[%s797_s5 + $0x38] sm:$0xff]   ;;  %v180_v28 = vld [vmem:[%s798_s0 + $0x10] sm:$0xff] }
   0x9   :  { %539 = vmatmul.mubr.msk.bf16.vlgmr.msra.gmra.mrb[0].mxu0 %vm69_vm2, %v605_v6  ;;  %573 = vmatpush3.bf16.msra.mxu1 %v610_v10  ;;  %v186_v27 = vpack.c.bf16 %v179_v25, %v178_v24  ;;  %v181_v29 = vld [vmem:[%s798_s0 + $0x18] sm:$0xff]  ;;  %v182_v31 = vld [vmem:[%s798_s0 + $0x20] sm:$0xff]  ;;  %v183_v32 = vld [vmem:[%s798_s0 + $0x28] sm:$0xff] }
   0xa   :  { %542 = vmatprep.mubr.msk.bf16.mxu0 %vm69_vm2, %v606_v7  ;;  %547 = vmatpush3.bf16.msra.mxu0 %v609_v9  ;;  %v187_v30 = vpack.c.bf16 %v181_v29, %v180_v28  ;;  %v188_v33 = vpack.c.bf16 %v183_v32, %v182_v31  ;;  %v184_v34 = vld [vmem:[%s798_s0 + $0x30] sm:$0xff]  ;;  %v185_v35 = vld [vmem:[%s798_s0 + $0x38] sm:$0xff]  ;;  %v480_v37 = vld [vmem:[%s799_s3] ss:$0 sm:$0xff] }
   0xb   :  { %548 = vmatprep.subr.bf16.mxu0 %v611_v11  ;;  %574 = vmatprep.subr.bf16.mxu1 %v612_v12  ;;  %v189_v36 = vpack.c.bf16 %v185_v35, %v184_v34 }
   0xc   :  { %586 = vmatprep.mubr.bf16.mxu1 %v186_v27 }
   0xd   :  { %575 = vmatpush3.bf16.msra.mxu1 %v612_v12 }
   0xe   :  { %549 = vmatpush3.bf16.msra.mxu0 %v611_v11  ;;  %576 = vmatprep.subr.bf16.mxu1 %v614_v15 }
   0xf   :  { %550 = vmatprep.subr.bf16.mxu0 %v613_v13 }
  0x11   :  { %543 = vmatmul.mubr.msk.bf16.gmra.mrb[4].mxu0 %vm69_vm2, %v607_v14  ;;  %577 = vmatpush3.bf16.msra.mxu1 %v614_v15 }
  0x12   :  { %551 = vmatpush3.bf16.msra.mxu0 %v613_v13  ;;  %578 = vmatprep.subr.bf16.mxu1 %v616_v17 }
  0x13   :  { %552 = vmatprep.subr.bf16.mxu0 %v615_v16 }
  0x15   :  { %579 = vmatpush3.bf16.msra.mxu1 %v616_v17 }
  0x16   :  { %553 = vmatpush3.bf16.msra.mxu0 %v615_v16  ;;  %580 = vmatprep.subr.bf16.mxu1 %v618_v19 }
  0x17   :  { %554 = vmatprep.subr.bf16.mxu0 %v617_v18 }
  0x19   :  { %581 = vmatpush3.bf16.msra.mxu1 %v618_v19  ;;  %v506_v19 = vld [vmem:[%s800_s6] ss:$0 sm:$0xff] }
  0x1a   :  { %555 = vmatpush3.bf16.msra.mxu0 %v617_v18  ;;  %582 = vmatprep.subr.bf16.mxu1 %v620_v21 }
  0x1b   :  { %556 = vmatprep.subr.bf16.mxu0 %v619_v20 }
  0x1d   :  { %583 = vmatpush3.bf16.msra.mxu1 %v620_v21 }
  0x1e   :  { %557 = vmatpush3.bf16.msra.mxu0 %v619_v20  ;;  %584 = vmatprep.subr.bf16.mxu1 %v622_v23 }
  0x1f   :  { %558 = vmatprep.subr.bf16.mxu0 %v621_v22 }
  0x21   :  { %585 = vmatpush3.bf16.msra.mxu1 %v622_v23 }
  0x22   :  { %559 = vmatpush3.bf16.msra.mxu0 %v621_v22 }
  0x23   :  { %560 = vmatprep.subr.bf16.mxu0 %v623_v26 }
  0x24   :  { %587 = vmatmul.mubr.bf16.vlgmr.msra.gmra.mrb[0].mxu1 %v187_v30 }
  0x25   :  { %590 = vmatprep.mubr.bf16.mxu1 %v188_v33 }
  0x26   :  { %561 = vmatpush3.bf16.msra.mxu0 %v623_v26 }
  0x2c   :  { %591 = vmatmul.mubr.bf16.gmra.mrb[4].mxu1 %v189_v36 }
  0xdc   :  { %v540_v38 = vpop.f32.mrb[0].mxu0 }
  0xdd   :  { %v132_v39 = vadd.f32 %v540_v38, %v480_v37  ;;  %v123_v40 = vpop.f32.mrb[1].mxu0 }
  0xde   :  { %v124_v41 = vadd.f32 %v480_v37, %v123_v40  ;;  %v541_v42 = vpop.f32.mrb[2].mxu0 }
  0xdf   :  { %v164_v43 = vmul.f32 0.01, %v132_v39  ;;  %v135_v44 = vadd.f32 %v541_v42, %v480_v37  ;;  %v126_v45 = vpop.f32.mrb[3].mxu0  ;;  %vm156_vm3 = vcmp.ge.f32.partialorder %v132_v39, 0.0 }
  0xe0   :  { %v162_v46 = vmul.f32 0.01, %v124_v41  ;;  %v127_v47 = vadd.f32 %v480_v37, %v126_v45  ;;  %vm154_vm4 = vcmp.ge.f32.partialorder %v124_v41, 0.0 }
  0xe1   :  { %vm157_vm5 = vcmp.ge.f32.partialorder %v135_v44, 0.0  ;;  %v165_v48 = vmul.f32 0.01, %v135_v44  ;;  %v172_v50 = vsel %vm156_vm3, %v132_v39, %v164_v43 }
  0xe2   :  { %vm155_vm6 = vcmp.ge.f32.partialorder %v127_v47, 0.0  ;;  %v163_v49 = vmul.f32 0.01, %v127_v47  ;;  %v170_v54 = vsel %vm154_vm4, %v124_v41, %v162_v46 }
  0xe3   :  { %v173_v51 = vsel %vm157_vm5, %v135_v44, %v165_v48 }
  0xe4   :  { %v207_v52 = vpack.c.bf16 %v173_v51, %v172_v50  ;;  %v544_v53 = vpop.f32.mrb[4].mxu0  ;;  %v171_v55 = vsel %vm155_vm6, %v127_v47, %v163_v49 }
  0xe5   :  { %v148_v56 = vadd.f32 %v544_v53, %v480_v37  ;;  %v139_v57 = vpop.f32.mrb[5].mxu0  ;;  %v206_v58 = vpack.c.bf16 %v171_v55, %v170_v54 }
  0xe6   :  { %v140_v59 = vadd.f32 %v480_v37, %v139_v57  ;;  %v545_v60 = vpop.f32.mrb[6].mxu0 }
  0xe7   :  { %v168_v61 = vmul.f32 0.01, %v148_v56  ;;  %v151_v62 = vadd.f32 %v545_v60, %v480_v37  ;;  %v142_v63 = vpop.f32.mrb[7].mxu0  ;;  %562 = vmatprep.mubr.bf16.mxu0 %v206_v58  ;;  %vm160_vm7 = vcmp.ge.f32.partialorder %v148_v56, 0.0 }
  0xe8   :  { %v166_v0 = vmul.f32 0.01, %v140_v59  ;;  %v143_v1 = vadd.f32 %v480_v37, %v142_v63  ;;  %563 = vmatmul.mubr.bf16.vlgmr.msra.gmra.mrb[8].mxu0 %v207_v52  ;;  %vm158_vm8 = vcmp.ge.f32.partialorder %v140_v59, 0.0 }
  0xe9   :  { %vm161_vm9 = vcmp.ge.f32.partialorder %v151_v62, 0.0  ;;  %v169_v2 = vmul.f32 0.01, %v151_v62  ;;  %v176_v4 = vsel %vm160_vm7, %v148_v56, %v168_v61 }
  0xea   :  { %vm159_vm10 = vcmp.ge.f32.partialorder %v143_v1, 0.0  ;;  %v167_v3 = vmul.f32 0.01, %v143_v1  ;;  %v174_v6 = vsel %vm158_vm8, %v140_v59, %v166_v0 }
  0xeb   :  { %v177_v5 = vsel %vm161_vm9, %v151_v62, %v169_v2 }
  0xec   :  { %v175_v7 = vsel %vm159_vm10, %v143_v1, %v167_v3  ;;  %v209_v8 = vpack.c.bf16 %v177_v5, %v176_v4 }
  0xed   :  { %v208_v9 = vpack.c.bf16 %v175_v7, %v174_v6 }
  0xef   :  { %566 = vmatprep.mubr.bf16.mxu0 %v208_v9 }
  0xf0   :  { %567 = vmatmul.mubr.bf16.gmra.mrb[12].mxu0 %v209_v8 }
  0xf7   :  { %v588_v10 = vpop.f32.mrb[0].mxu1 }
  0xf8   :  { %v421_v11 = vpop.f32.mrb[1].mxu1 }
  0xf9   :  { %v589_v12 = vpop.f32.mrb[2].mxu1 }
  0xfa   :  { %v424_v13 = vpop.f32.mrb[3].mxu1 }
  0xff   :  { %v592_v14 = vpop.f32.mrb[4].mxu1 }
 0x100   :  { %v437_v15 = vpop.f32.mrb[5].mxu1 }
 0x101   :  { %v593_v16 = vpop.f32.mrb[6].mxu1 }
 0x102   :  { %v440_v17 = vpop.f32.mrb[7].mxu1 }
 0x1bb   :  { %v564_v18 = vpop.f32.mrb[8].mxu0 }
 0x1bc   :  { %v430_v20 = vadd.f32 %v588_v10, %v564_v18  ;;  %v308_v21 = vpop.f32.mrb[9].mxu0 }
 0x1bd   :  { %v422_v22 = vadd.f32 %v421_v11, %v308_v21  ;;  %v565_v23 = vpop.f32.mrb[10].mxu0 }
 0x1be   :  { %v461_v24 = vadd.f32 %v506_v19, %v430_v20  ;;  %v433_v25 = vadd.f32 %v589_v12, %v565_v23  ;;  %v311_v26 = vpop.f32.mrb[11].mxu0 }
 0x1bf   :  { %v459_v27 = vadd.f32 %v506_v19, %v422_v22  ;;  %v425_v28 = vadd.f32 %v424_v13, %v311_v26 }
 0x1c0   :  { %470 = vst.msk [vmem:[%s801_s7 + $0x10] sm:$0xff] %vm467_vm11, %v461_v24  ;;  %v462_v29 = vadd.f32 %v506_v19, %v433_v25 }
 0x1c1   :  { %468 = vst.msk [vmem:[%s801_s7] sm:$0xff] %vm467_vm11, %v459_v27  ;;  %v460_v30 = vadd.f32 %v506_v19, %v425_v28 }
 0x1c2   :  { %471 = vst.msk [vmem:[%s801_s7 + $0x18] sm:$0xff] %vm467_vm11, %v462_v29 }
 0x1c3   :  { %469 = vst.msk [vmem:[%s801_s7 + $0x8] sm:$0xff] %vm467_vm11, %v460_v30  ;;  %v568_v31 = vpop.f32.mrb[12].mxu0 }
 0x1c4   :  { %v446_v32 = vadd.f32 %v592_v14, %v568_v31  ;;  %v324_v33 = vpop.f32.mrb[13].mxu0 }
 0x1c5   :  { %v438_v34 = vadd.f32 %v437_v15, %v324_v33  ;;  %v569_v35 = vpop.f32.mrb[14].mxu0 }
 0x1c6   :  { %v465_v36 = vadd.f32 %v506_v19, %v446_v32  ;;  %v449_v37 = vadd.f32 %v593_v16, %v569_v35  ;;  %v327_v38 = vpop.f32.mrb[15].mxu0 }
 0x1c7   :  { %v463_v39 = vadd.f32 %v506_v19, %v438_v34  ;;  %v441_v40 = vadd.f32 %v440_v17, %v327_v38 }
 0x1c8   :  { %474 = vst.msk [vmem:[%s801_s7 + $0x30] sm:$0xff] %vm467_vm11, %v465_v36  ;;  %v466_v41 = vadd.f32 %v506_v19, %v449_v37 }
 0x1c9   :  { %472 = vst.msk [vmem:[%s801_s7 + $0x20] sm:$0xff] %vm467_vm11, %v463_v39  ;;  %v464_v42 = vadd.f32 %v506_v19, %v441_v40 }
 0x1ca   :  { %475 = vst.msk [vmem:[%s801_s7 + $0x38] sm:$0xff] %vm467_vm11, %v466_v41 }
 0x1cb   :  { %473 = vst.msk [vmem:[%s801_s7 + $0x28] sm:$0xff] %vm467_vm11, %v464_v42 }

// kernel: coma_critic_forward.4
= control target key start
LH: loop header
LB: loop body
LE: loop exit
PB: predicated region body
PF: predicated region fallthrough
CT: control target
= control target key end

     0   :  { %v1515_v1 = vmov 0.0   ;;  %v1516_v2 = vmov 0   ;;  %vm1517_vm0 = vmmov 0   ;;  %v1518_v25 = vmov 0.0|0.0   ;;  %s2128_s1 = inlined_call_operand.vmem [shape: bf16[128,384], index: 1, kind: input, shape index: {}]   ;;  %s2129_s2 = inlined_call_operand.vmem [shape: f32[1,384], index: 2, kind: input, shape index: {}]   ;;  %s2130_s0 = inlined_call_operand.vmem [shape: f32[8,8,384], index: 0, kind: input, shape index: {}]   ;;  %s2131_s3 = inlined_call_operand.vmem [shape: f32[8,8,128], index: 3, kind: output, shape index: {}]  }
   0x1   :  { %v1542_v0 = vld [vmem:[%s2128_s1 + $0x4] ss:$12 sps:$4 sm:$0xff]   ;;  %1227 = vmatprep.subr.bf16.mxu1 %v1515_v1  ;;  %234 = vmatprep.mubr.bf16.mxu0 %v1516_v2  ;;  %v1549_v3 = vld [vmem:[%s2128_s1] ss:$12 sps:$4 sm:$0xff]   ;;  %v1557_v4 = vld [vmem:[%s2128_s1 + $0x1c] ss:$12 sps:$4 sm:$0xff]   ;;  %v54_v27 = vlaneseq }
   0x2   :  { %1243 = vmatprep.mubr.msk.bf16.mxu1 %vm1517_vm0, %v1515_v1  ;;  %202 = vmatprep.subr.bf16.mxu0 %v1542_v0  ;;  %v1563_v5 = vld [vmem:[%s2128_s1 + $0x18] ss:$12 sps:$4 sm:$0xff]   ;;  %v1569_v6 = vld [vmem:[%s2128_s1 + $0x34] ss:$12 sps:$4 sm:$0xff]   ;;  %v1575_v7 = vld [vmem:[%s2128_s1 + $0x30] ss:$12 sps:$4 sm:$0xff]  }
   0x3   :  { %203 = vmatpush1.bf16.msra.mxu0 %v1549_v3  ;;  %v1581_v8 = vld [vmem:[%s2128_s1 + $0x4c] ss:$12 sps:$4 sm:$0xff]   ;;  %v1586_v9 = vld [vmem:[%s2128_s1 + $0x8] ss:$12 sps:$4 sm:$0xff]   ;;  %v1597_v11 = vld [vmem:[%s2128_s1 + $0x64] ss:$12 sps:$4 sm:$0xff]  }
   0x4   :  { %204 = vmatprep.subr.bf16.mxu0 %v1557_v4  ;;  %v1592_v10 = vld [vmem:[%s2128_s1 + $0x48] ss:$12 sps:$4 sm:$0xff]   ;;  %1228 = vmatpush3.bf16.msra.mxu1 %v1586_v9  ;;  %v1604_v12 = vld [vmem:[%s2128_s1 + $0x20] ss:$12 sps:$4 sm:$0xff]   ;;  %v1623_v15 = vld [vmem:[%s2128_s1 + $0x38] ss:$12 sps:$4 sm:$0xff]  }
   0x5   :  { %1229 = vmatprep.subr.bf16.mxu1 %v1515_v1  ;;  %v1610_v13 = vld [vmem:[%s2128_s1 + $0x60] ss:$12 sps:$4 sm:$0xff]   ;;  %v1616_v14 = vld [vmem:[%s2128_s1 + $0x7c] ss:$12 sps:$4 sm:$0xff]   ;;  %v1630_v16 = vld [vmem:[%s2128_s1 + $0x78] ss:$12 sps:$4 sm:$0xff]  }
   0x6   :  { %v1636_v17 = vld [vmem:[%s2128_s1 + $0x94] ss:$12 sps:$4 sm:$0xff]   ;;  %v1642_v18 = vld [vmem:[%s2128_s1 + $0x50] ss:$12 sps:$4 sm:$0xff]   ;;  %v1655_v20 = vld [vmem:[%s2128_s1 + $0xac] ss:$12 sps:$4 sm:$0xff]  }
   0x7   :  { %205 = vmatpush1.bf16.msra.mxu0 %v1563_v5  ;;  %v1649_v19 = vld [vmem:[%s2128_s1 + $0x90] ss:$12 sps:$4 sm:$0xff]   ;;  %v1661_v21 = vld [vmem:[%s2128_s1 + $0x68] ss:$12 sps:$4 sm:$0xff]   ;;  %v1675_v23 = vld [vmem:[%s2128_s1 + $0x80] ss:$12 sps:$4 sm:$0xff]  }
   0x8   :  { %206 = vmatprep.subr.bf16.mxu0 %v1569_v6  ;;  %1230 = vmatpush3.bf16.msra.mxu1 %v1604_v12  ;;  %v1668_v22 = vld [vmem:[%s2128_s1 + $0xa8] ss:$12 sps:$4 sm:$0xff]   ;;  %v1683_v24 = vld [vmem:[%s2128_s1 + $0x98] ss:$12 sps:$4 sm:$0xff]   ;;  %v1693_v26 = vld [vmem:[%s2128_s1 + $0xb0] ss:$12 sps:$4 sm:$0xff]  }
   0x9   :  { %1231 = vmatprep.subr.bf16.mxu1 %v1515_v1  ;;  %v55_v28 = vshrl.u32 %v54_v27, 7  ;;  %v52_v30 = vld [vmem:[%s2129_s2] sm:$0x7]  ;;  %v70_v41 = vld [vmem:[%s2130_s0 + $0x8] sm:$0xff]  ;;  %v71_v58 = vld [vmem:[%s2130_s0 + $0x10] sm:$0xff] }
   0xa   :  { %v69_v34 = vld [vmem:[%s2130_s0] sm:$0xff] }
   0xb   :  { %207 = vmatpush1.bf16.msra.mxu0 %v1575_v7  ;;  %v56_v29 = vsub.s32 0, %v55_v28  ;;  %v60_v31 = vsub.s32 1, %v55_v28  ;;  %v64_v52 = vsub.s32 2, %v55_v28 }
   0xc   :  { %208 = vmatprep.subr.bf16.mxu0 %v1581_v8  ;;  %1232 = vmatpush3.bf16.msra.mxu1 %v1623_v15 }
   0xd   :  { %1233 = vmatprep.subr.bf16.mxu1 %v1515_v1  ;;  %v1734_v32 = vrot.slane %v52_v30, %v56_v29  ;;  %v1736_v33 = vrot.slane %v52_v30, %v60_v31  ;;  %v1746_v53 = vrot.slane %v52_v30, %v64_v52  ;;  %v1113_v30 = vld [vmem:[%s2130_s0 + $0x18] sm:$0xff] }
   0xf   :  { %209 = vmatpush1.bf16.msra.mxu0 %v1592_v10 }
  0x10   :  { %210 = vmatprep.subr.bf16.mxu0 %v1597_v11  ;;  %1234 = vmatpush3.bf16.msra.mxu1 %v1642_v18 }
  0x11   :  { %1235 = vmatprep.subr.bf16.mxu1 %v1515_v1 }
  0x13   :  { %211 = vmatpush1.bf16.msra.mxu0 %v1610_v13 }
  0x14   :  { %212 = vmatprep.subr.bf16.mxu0 %v1616_v14  ;;  %1236 = vmatpush3.bf16.msra.mxu1 %v1661_v21 }
  0x15   :  { %1237 = vmatprep.subr.bf16.mxu1 %v1515_v1 }
  0x17   :  { %213 = vmatpush1.bf16.msra.mxu0 %v1630_v16 }
  0x18   :  { %214 = vmatprep.subr.bf16.mxu0 %v1636_v17  ;;  %1238 = vmatpush3.bf16.msra.mxu1 %v1675_v23 }
  0x19   :  { %1239 = vmatprep.subr.bf16.mxu1 %v1515_v1 }
  0x1b   :  { %215 = vmatpush1.bf16.msra.mxu0 %v1649_v19 }
  0x1c   :  { %216 = vmatprep.subr.bf16.mxu0 %v1655_v20  ;;  %1240 = vmatpush3.bf16.msra.mxu1 %v1683_v24 }
  0x1d   :  { %1241 = vmatprep.subr.bf16.mxu1 %v1515_v1 }
  0x1f   :  { %217 = vmatpush1.bf16.msra.mxu0 %v1668_v22 }
  0x20   :  { %312 = vmatprep.subr.bf16.mxu0 %v1542_v0  ;;  %1242 = vmatpush3.bf16.msra.mxu1 %v1693_v26 }
  0x21   :  { %1247 = vmatprep.subr.bf16.mxu1 %v1515_v1 }
  0x22   :  { %235 = vmatmul.mubr.bf16.vlgmr.msra.gmra.mrb[0].mxu0 %v1518_v25 }
  0x23   :  { %313 = vmatpush1.bf16.msra.mxu0 %v1549_v3  ;;  %344 = vmatprep.mubr.bf16.mxu0 %v1516_v2 }
  0x24   :  { %314 = vmatprep.subr.bf16.mxu0 %v1557_v4  ;;  %1244 = vmatmul.mubr.bf16.vlgmr.msra.gmra.mrb[0].mxu1 %v1518_v25 }
  0x25   :  { %1248 = vmatpush3.bf16.msra.mxu1 %v1586_v9  ;;  %1263 = vmatprep.mubr.msk.bf16.mxu1 %vm1517_vm0, %v1515_v1 }
  0x26   :  { %1249 = vmatprep.subr.bf16.mxu1 %v1515_v1 }
  0x27   :  { %315 = vmatpush1.bf16.msra.mxu0 %v1563_v5 }
  0x28   :  { %316 = vmatprep.subr.bf16.mxu0 %v1569_v6 }
  0x29   :  { %1250 = vmatpush3.bf16.msra.mxu1 %v1604_v12 }
  0x2a   :  { %1251 = vmatprep.subr.bf16.mxu1 %v1515_v1 }
  0x2b   :  { %317 = vmatpush1.bf16.msra.mxu0 %v1575_v7 }
  0x2c   :  { %318 = vmatprep.subr.bf16.mxu0 %v1581_v8 }
  0x2d   :  { %1252 = vmatpush3.bf16.msra.mxu1 %v1623_v15 }
  0x2e   :  { %1253 = vmatprep.subr.bf16.mxu1 %v1515_v1 }
  0x2f   :  { %319 = vmatpush1.bf16.msra.mxu0 %v1592_v10 }
  0x30   :  { %320 = vmatprep.subr.bf16.mxu0 %v1597_v11 }
  0x31   :  { %1254 = vmatpush3.bf16.msra.mxu1 %v1642_v18 }
  0x32   :  { %1255 = vmatprep.subr.bf16.mxu1 %v1515_v1 }
  0x33   :  { %321 = vmatpush1.bf16.msra.mxu0 %v1610_v13 }
  0x34   :  { %322 = vmatprep.subr.bf16.mxu0 %v1616_v14 }
  0x35   :  { %1256 = vmatpush3.bf16.msra.mxu1 %v1661_v21 }
  0x36   :  { %1257 = vmatprep.subr.bf16.mxu1 %v1515_v1 }
  0x37   :  { %323 = vmatpush1.bf16.msra.mxu0 %v1630_v16 }
  0x38   :  { %324 = vmatprep.subr.bf16.mxu0 %v1636_v17 }
  0x39   :  { %1258 = vmatpush3.bf16.msra.mxu1 %v1675_v23 }
  0x3a   :  { %1259 = vmatprep.subr.bf16.mxu1 %v1515_v1 }
  0x3b   :  { %325 = vmatpush1.bf16.msra.mxu0 %v1649_v19 }
  0x3c   :  { %326 = vmatprep.subr.bf16.mxu0 %v1655_v20 }
  0x3d   :  { %1260 = vmatpush3.bf16.msra.mxu1 %v1683_v24 }
  0x3e   :  { %1261 = vmatprep.subr.bf16.mxu1 %v1515_v1 }
  0x3f   :  { %327 = vmatpush1.bf16.msra.mxu0 %v1668_v22 }
  0x40   :  { %423 = vmatprep.subr.bf16.mxu0 %v1542_v0 }
  0x41   :  { %1262 = vmatpush3.bf16.msra.mxu1 %v1693_v26 }
  0x42   :  { %1267 = vmatprep.subr.bf16.mxu1 %v1515_v1 }
  0xf5   :  { %v236_v35 = vpop.f32.mrb[0].mxu0 }
  0xf6   :  { %v237_v36 = vadd.f32 %v236_v35, %v1734_v32  ;;  %v238_v37 = vpop.f32.mrb[1].mxu0 }
  0xf7   :  { %v239_v38 = vadd.f32 %v238_v37, %v1736_v33  ;;  %v240_v39 = vpop.f32.mrb[2].mxu0  ;;  %v277_v45 = vpop.f32.mrb[0].mxu1 }
  0xf8   :  { %v283_v40 = vadd.f32 %v237_v36, %v69_v34  ;;  %v241_v42 = vpop.f32.mrb[3].mxu0  ;;  %v1245_v47 = vpop.f32.mrb[1].mxu1  ;;  %v278_v56 = vadd.f32 %v277_v45, %v1746_v53 }
  0xf9   :  { %v290_v44 = vadd.f32 %v239_v38, %v70_v41  ;;  %v280_v48 = vpop.f32.mrb[2].mxu1  ;;  %v1114_v42 = vld [vmem:[%s2130_s0 + $0x20] sm:$0xff] }
  0xfa   :  { %v1111_v43 = vmul.f32 -1.442695, %v283_v40  ;;  %v1246_v49 = vpop.f32.mrb[3].mxu1 }
  0xfb   :  { %v1112_v46 = vmul.f32 -1.442695, %v290_v44 }
  0xfc   :  { %1423 = vpow2.f32 %v1111_v43 }
  0xfd   :  { %1425 = vpow2.f32 %v1112_v46 }
 0x106   :  { %v1424_v50 = vpop.eup %1423 }
 0x107   :  { %v287_v51 = vadd.f32 1.0, %v1424_v50  ;;  %v1426_v54 = vpop.eup %1425 }
 0x108   :  { %v294_v55 = vadd.f32 1.0, %v1426_v54 }
 0x109   :  { %1427 = vrcp.f32 %v287_v51 }
 0x10a   :  { %1429 = vrcp.f32 %v294_v55  ;;  %v1115_v55 = vld [vmem:[%s2130_s0 + $0x28] sm:$0xff] }
 0x113   :  { %v1428_v57 = vpop.eup %1427 }
 0x114   :  { %v297_v59 = vmul.f32 %v1428_v57, %v278_v56  ;;  %v1430_v61 = vpop.eup %1429 }
 0x115   :  { %v300_v62 = vsub.f32 1.0, %v1430_v61  ;;  %v302_v27 = vmul.f32 0.0, %v1430_v61 }
 0x116   :  { %v298_v60 = vadd.f32 %v297_v59, %v71_v58 }
 0x118   :  { %1431 = vtanh.f32 %v298_v60 }
 0x122   :  { %v1432_v63 = vpop.eup %1431 }
 0x123   :  { %v301_v25 = vmul.f32 %v1432_v63, %v300_v62 }
 0x125   :  { %v1752_v28 = vadd.f32 %v302_v27, %v301_v25  ;;  %v1119_v27 = vld [vmem:[%s2130_s0 + $0x30] sm:$0xff] }
 0x127   :  { %305 = vst [vmem:[%s2131_s3] sm:$0xff] %v1752_v28  ;;  %v311_v29 = vpack.c.bf16 %v1752_v28, %v1752_v28 }
 0x129   :  { %345 = vmatmul.mubr.bf16.vlgmr.msra.gmra.mrb[4].mxu0 %v311_v29  ;;  %1264 = vmatmul.mubr.bf16.vlgmr.msra.gmra.mrb[4].mxu1 %v311_v29 }
 0x12a   :  { %424 = vmatpush1.bf16.msra.mxu0 %v1549_v3  ;;  %1268 = vmatpush3.bf16.msra.mxu1 %v1586_v9 }
 0x12b   :  { %425 = vmatprep.subr.bf16.mxu0 %v1557_v4  ;;  %1269 = vmatprep.subr.bf16.mxu1 %v1515_v1 }
 0x12c   :  { %455 = vmatprep.mubr.bf16.mxu0 %v1516_v2  ;;  %1283 = vmatprep.mubr.msk.bf16.mxu1 %vm1517_vm0, %v1515_v1 }
 0x12e   :  { %426 = vmatpush1.bf16.msra.mxu0 %v1563_v5  ;;  %1270 = vmatpush3.bf16.msra.mxu1 %v1604_v12 }
 0x12f   :  { %427 = vmatprep.subr.bf16.mxu0 %v1569_v6  ;;  %1271 = vmatprep.subr.bf16.mxu1 %v1515_v1 }
 0x132   :  { %428 = vmatpush1.bf16.msra.mxu0 %v1575_v7  ;;  %1272 = vmatpush3.bf16.msra.mxu1 %v1623_v15 }
 0x133   :  { %429 = vmatprep.subr.bf16.mxu0 %v1581_v8  ;;  %1273 = vmatprep.subr.bf16.mxu1 %v1515_v1 }
 0x136   :  { %430 = vmatpush1.bf16.msra.mxu0 %v1592_v10  ;;  %1274 = vmatpush3.bf16.msra.mxu1 %v1642_v18 }
 0x137   :  { %431 = vmatprep.subr.bf16.mxu0 %v1597_v11  ;;  %1275 = vmatprep.subr.bf16.mxu1 %v1515_v1 }
 0x13a   :  { %432 = vmatpush1.bf16.msra.mxu0 %v1610_v13  ;;  %1276 = vmatpush3.bf16.msra.mxu1 %v1661_v21 }
 0x13b   :  { %433 = vmatprep.subr.bf16.mxu0 %v1616_v14  ;;  %1277 = vmatprep.subr.bf16.mxu1 %v1515_v1 }
 0x13e   :  { %434 = vmatpush1.bf16.msra.mxu0 %v1630_v16  ;;  %1278 = vmatpush3.bf16.msra.mxu1 %v1675_v23 }
 0x13f   :  { %435 = vmatprep.subr.bf16.mxu0 %v1636_v17  ;;  %1279 = vmatprep.subr.bf16.mxu1 %v1515_v1 }
 0x142   :  { %436 = vmatpush1.bf16.msra.mxu0 %v1649_v19  ;;  %1280 = vmatpush3.bf16.msra.mxu1 %v1683_v24 }
 0x143   :  { %437 = vmatprep.subr.bf16.mxu0 %v1655_v20  ;;  %1281 = vmatprep.subr.bf16.mxu1 %v1515_v1 }
 0x146   :  { %438 = vmatpush1.bf16.msra.mxu0 %v1668_v22  ;;  %1282 = vmatpush3.bf16.msra.mxu1 %v1693_v26 }
 0x147   :  { %534 = vmatprep.subr.bf16.mxu0 %v1542_v0  ;;  %1287 = vmatprep.subr.bf16.mxu1 %v1515_v1 }
 0x1fc   :  { %v346_v31 = vpop.f32.mrb[4].mxu0  ;;  %v387_v34 = vpop.f32.mrb[4].mxu1 }
 0x1fd   :  { %v347_v35 = vadd.f32 %v346_v31, %v1734_v32  ;;  %v348_v36 = vpop.f32.mrb[5].mxu0  ;;  %v1265_v37 = vpop.f32.mrb[5].mxu1  ;;  %v388_v52 = vadd.f32 %v387_v34, %v1746_v53 }
 0x1fe   :  { %v349_v38 = vadd.f32 %v348_v36, %v1736_v33  ;;  %v350_v39 = vpop.f32.mrb[6].mxu0  ;;  %v390_v40 = vpop.f32.mrb[6].mxu1 }
 0x1ff   :  { %v393_v41 = vadd.f32 %v1113_v30, %v347_v35  ;;  %v351_v43 = vpop.f32.mrb[7].mxu0  ;;  %v1266_v44 = vpop.f32.mrb[7].mxu1  ;;  %v1120_v39 = vld [vmem:[%s2130_s0 + $0x38] sm:$0xff] }
 0x200   :  { %v400_v46 = vadd.f32 %v1114_v42, %v349_v38 }
 0x201   :  { %v1116_v45 = vmul.f32 -1.442695, %v393_v41 }
 0x202   :  { %v1117_v47 = vmul.f32 -1.442695, %v400_v46 }
 0x203   :  { %1433 = vpow2.f32 %v1116_v45 }
 0x204   :  { %1435 = vpow2.f32 %v1117_v47 }
 0x20d   :  { %v1434_v48 = vpop.eup %1433 }
 0x20e   :  { %v397_v49 = vadd.f32 1.0, %v1434_v48  ;;  %v1436_v50 = vpop.eup %1435 }
 0x20f   :  { %v404_v51 = vadd.f32 1.0, %v1436_v50 }
 0x210   :  { %1437 = vrcp.f32 %v397_v49 }
 0x211   :  { %1439 = vrcp.f32 %v404_v51  ;;  %v1121_v51 = vld [vmem:[%s2130_s0 + $0x40] sm:$0xff] }
 0x21a   :  { %v1438_v54 = vpop.eup %1437 }
 0x21b   :  { %v407_v56 = vmul.f32 %v1438_v54, %v388_v52  ;;  %v1440_v58 = vpop.eup %1439 }
 0x21c   :  { %v410_v59 = vsub.f32 1.0, %v1440_v58  ;;  %v412_v62 = vmul.f32 %v1440_v58, %v1752_v28 }
 0x21d   :  { %v408_v57 = vadd.f32 %v1115_v55, %v407_v56 }
 0x21f   :  { %1441 = vtanh.f32 %v408_v57 }
 0x229   :  { %v1442_v60 = vpop.eup %1441 }
 0x22a   :  { %v411_v61 = vmul.f32 %v1442_v60, %v410_v59 }
 0x22c   :  { %v1808_v63 = vadd.f32 %v412_v62, %v411_v61  ;;  %v1125_v62 = vld [vmem:[%s2130_s0 + $0x48] sm:$0xff] }
 0x22e   :  { %1118 = vst [vmem:[%s2131_s3 + $0x8] sm:$0xff] %v1808_v63  ;;  %v422_v25 = vpack.c.bf16 %v1808_v63, %v1808_v63 }
 0x230   :  { %456 = vmatmul.mubr.bf16.vlgmr.msra.gmra.mrb[8].mxu0 %v422_v25  ;;  %1284 = vmatmul.mubr.bf16.vlgmr.msra.gmra.mrb[8].mxu1 %v422_v25 }
 0x231   :  { %535 = vmatpush1.bf16.msra.mxu0 %v1549_v3  ;;  %1288 = vmatpush3.bf16.msra.mxu1 %v1586_v9 }
 0x232   :  { %536 = vmatprep.subr.bf16.mxu0 %v1557_v4  ;;  %1289 = vmatprep.subr.bf16.mxu1 %v1515_v1 }
 0x233   :  { %566 = vmatprep.mubr.bf16.mxu0 %v1516_v2  ;;  %1303 = vmatprep.mubr.msk.bf16.mxu1 %vm1517_vm0, %v1515_v1 }
 0x235   :  { %537 = vmatpush1.bf16.msra.mxu0 %v1563_v5  ;;  %1290 = vmatpush3.bf16.msra.mxu1 %v1604_v12 }
 0x236   :  { %538 = vmatprep.subr.bf16.mxu0 %v1569_v6  ;;  %1291 = vmatprep.subr.bf16.mxu1 %v1515_v1 }
 0x239   :  { %539 = vmatpush1.bf16.msra.mxu0 %v1575_v7  ;;  %1292 = vmatpush3.bf16.msra.mxu1 %v1623_v15 }
 0x23a   :  { %540 = vmatprep.subr.bf16.mxu0 %v1581_v8  ;;  %1293 = vmatprep.subr.bf16.mxu1 %v1515_v1 }
 0x23d   :  { %541 = vmatpush1.bf16.msra.mxu0 %v1592_v10  ;;  %1294 = vmatpush3.bf16.msra.mxu1 %v1642_v18 }
 0x23e   :  { %542 = vmatprep.subr.bf16.mxu0 %v1597_v11  ;;  %1295 = vmatprep.subr.bf16.mxu1 %v1515_v1 }
 0x241   :  { %543 = vmatpush1.bf16.msra.mxu0 %v1610_v13  ;;  %1296 = vmatpush3.bf16.msra.mxu1 %v1661_v21 }
 0x242   :  { %544 = vmatprep.subr.bf16.mxu0 %v1616_v14  ;;  %1297 = vmatprep.subr.bf16.mxu1 %v1515_v1 }
 0x245   :  { %545 = vmatpush1.bf16.msra.mxu0 %v1630_v16  ;;  %1298 = vmatpush3.bf16.msra.mxu1 %v1675_v23 }
 0x246   :  { %546 = vmatprep.subr.bf16.mxu0 %v1636_v17  ;;  %1299 = vmatprep.subr.bf16.mxu1 %v1515_v1 }
 0x249   :  { %547 = vmatpush1.bf16.msra.mxu0 %v1649_v19  ;;  %1300 = vmatpush3.bf16.msra.mxu1 %v1683_v24 }
 0x24a   :  { %548 = vmatprep.subr.bf16.mxu0 %v1655_v20  ;;  %1301 = vmatprep.subr.bf16.mxu1 %v1515_v1 }
 0x24d   :  { %549 = vmatpush1.bf16.msra.mxu0 %v1668_v22  ;;  %1302 = vmatpush3.bf16.msra.mxu1 %v1693_v26 }
 0x24e   :  { %645 = vmatprep.subr.bf16.mxu0 %v1542_v0  ;;  %1307 = vmatprep.subr.bf16.mxu1 %v1515_v1 }
 0x303   :  { %v457_v28 = vpop.f32.mrb[8].mxu0  ;;  %v498_v29 = vpop.f32.mrb[8].mxu1 }
 0x304   :  { %v458_v30 = vadd.f32 %v457_v28, %v1734_v32  ;;  %v459_v31 = vpop.f32.mrb[9].mxu0  ;;  %v1285_v34 = vpop.f32.mrb[9].mxu1  ;;  %v499_v49 = vadd.f32 %v498_v29, %v1746_v53 }
 0x305   :  { %v460_v35 = vadd.f32 %v459_v31, %v1736_v33  ;;  %v461_v36 = vpop.f32.mrb[10].mxu0  ;;  %v501_v37 = vpop.f32.mrb[10].mxu1 }
 0x306   :  { %v504_v38 = vadd.f32 %v1119_v27, %v458_v30  ;;  %v462_v40 = vpop.f32.mrb[11].mxu0  ;;  %v1286_v41 = vpop.f32.mrb[11].mxu1  ;;  %v1126_v36 = vld [vmem:[%s2130_s0 + $0x50] sm:$0xff] }
 0x307   :  { %v511_v43 = vadd.f32 %v1120_v39, %v460_v35 }
 0x308   :  { %v1122_v42 = vmul.f32 -1.442695, %v504_v38 }
 0x309   :  { %v1123_v44 = vmul.f32 -1.442695, %v511_v43 }
 0x30a   :  { %1443 = vpow2.f32 %v1122_v42 }
 0x30b   :  { %1445 = vpow2.f32 %v1123_v44 }
 0x314   :  { %v1444_v45 = vpop.eup %1443 }
 0x315   :  { %v508_v46 = vadd.f32 1.0, %v1444_v45  ;;  %v1446_v47 = vpop.eup %1445 }
 0x316   :  { %v515_v48 = vadd.f32 1.0, %v1446_v47 }
 0x317   :  { %1447 = vrcp.f32 %v508_v46 }
 0x318   :  { %1449 = vrcp.f32 %v515_v48  ;;  %v1127_v48 = vld [vmem:[%s2130_s0 + $0x58] sm:$0xff] }
 0x321   :  { %v1448_v50 = vpop.eup %1447 }
 0x322   :  { %v518_v52 = vmul.f32 %v1448_v50, %v499_v49  ;;  %v1450_v55 = vpop.eup %1449 }
 0x323   :  { %v521_v56 = vsub.f32 1.0, %v1450_v55  ;;  %v523_v59 = vmul.f32 %v1450_v55, %v1808_v63 }
 0x324   :  { %v519_v54 = vadd.f32 %v1121_v51, %v518_v52 }
 0x326   :  { %1451 = vtanh.f32 %v519_v54 }
 0x330   :  { %v1452_v57 = vpop.eup %1451 }
 0x331   :  { %v522_v58 = vmul.f32 %v1452_v57, %v521_v56 }
 0x333   :  { %v1864_v60 = vadd.f32 %v523_v59, %v522_v58  ;;  %v1131_v59 = vld [vmem:[%s2130_s0 + $0x60] sm:$0xff] }
 0x335   :  { %1124 = vst [vmem:[%s2131_s3 + $0x10] sm:$0xff] %v1864_v60  ;;  %v533_v61 = vpack.c.bf16 %v1864_v60, %v1864_v60 }
 0x337   :  { %567 = vmatmul.mubr.bf16.vlgmr.msra.gmra.mrb[12].mxu0 %v533_v61  ;;  %1304 = vmatmul.mubr.bf16.vlgmr.msra.gmra.mrb[12].mxu1 %v533_v61 }
 0x338   :  { %646 = vmatpush1.bf16.msra.mxu0 %v1549_v3  ;;  %1308 = vmatpush3.bf16.msra.mxu1 %v1586_v9 }
 0x339   :  { %647 = vmatprep.subr.bf16.mxu0 %v1557_v4  ;;  %1309 = vmatprep.subr.bf16.mxu1 %v1515_v1 }
 0x33a   :  { %677 = vmatprep.mubr.bf16.mxu0 %v1516_v2  ;;  %1323 = vmatprep.mubr.msk.bf16.mxu1 %vm1517_vm0, %v1515_v1 }
 0x33c   :  { %648 = vmatpush1.bf16.msra.mxu0 %v1563_v5  ;;  %1310 = vmatpush3.bf16.msra.mxu1 %v1604_v12 }
 0x33d   :  { %649 = vmatprep.subr.bf16.mxu0 %v1569_v6  ;;  %1311 = vmatprep.subr.bf16.mxu1 %v1515_v1 }
 0x340   :  { %650 = vmatpush1.bf16.msra.mxu0 %v1575_v7  ;;  %1312 = vmatpush3.bf16.msra.mxu1 %v1623_v15 }
 0x341   :  { %651 = vmatprep.subr.bf16.mxu0 %v1581_v8  ;;  %1313 = vmatprep.subr.bf16.mxu1 %v1515_v1 }
 0x344   :  { %652 = vmatpush1.bf16.msra.mxu0 %v1592_v10  ;;  %1314 = vmatpush3.bf16.msra.mxu1 %v1642_v18 }
 0x345   :  { %653 = vmatprep.subr.bf16.mxu0 %v1597_v11  ;;  %1315 = vmatprep.subr.bf16.mxu1 %v1515_v1 }
 0x348   :  { %654 = vmatpush1.bf16.msra.mxu0 %v1610_v13  ;;  %1316 = vmatpush3.bf16.msra.mxu1 %v1661_v21 }
 0x349   :  { %655 = vmatprep.subr.bf16.mxu0 %v1616_v14  ;;  %1317 = vmatprep.subr.bf16.mxu1 %v1515_v1 }
 0x34c   :  { %656 = vmatpush1.bf16.msra.mxu0 %v1630_v16  ;;  %1318 = vmatpush3.bf16.msra.mxu1 %v1675_v23 }
 0x34d   :  { %657 = vmatprep.subr.bf16.mxu0 %v1636_v17  ;;  %1319 = vmatprep.subr.bf16.mxu1 %v1515_v1 }
 0x350   :  { %658 = vmatpush1.bf16.msra.mxu0 %v1649_v19  ;;  %1320 = vmatpush3.bf16.msra.mxu1 %v1683_v24 }
 0x351   :  { %659 = vmatprep.subr.bf16.mxu0 %v1655_v20  ;;  %1321 = vmatprep.subr.bf16.mxu1 %v1515_v1 }
 0x354   :  { %660 = vmatpush1.bf16.msra.mxu0 %v1668_v22  ;;  %1322 = vmatpush3.bf16.msra.mxu1 %v1693_v26 }
 0x355   :  { %756 = vmatprep.subr.bf16.mxu0 %v1542_v0  ;;  %1327 = vmatprep.subr.bf16.mxu1 %v1515_v1 }
 0x40a   :  { %v568_v63 = vpop.f32.mrb[12].mxu0  ;;  %v609_v25 = vpop.f32.mrb[12].mxu1 }
 0x40b   :  { %v569_v27 = vadd.f32 %v568_v63, %v1734_v32  ;;  %v570_v28 = vpop.f32.mrb[13].mxu0  ;;  %v1305_v29 = vpop.f32.mrb[13].mxu1  ;;  %v610_v46 = vadd.f32 %v609_v25, %v1746_v53 }
 0x40c   :  { %v571_v30 = vadd.f32 %v570_v28, %v1736_v33  ;;  %v572_v31 = vpop.f32.mrb[14].mxu0  ;;  %v612_v34 = vpop.f32.mrb[14].mxu1 }
 0x40d   :  { %v615_v35 = vadd.f32 %v1125_v62, %v569_v27  ;;  %v573_v37 = vpop.f32.mrb[15].mxu0  ;;  %v1306_v38 = vpop.f32.mrb[15].mxu1  ;;  %v1132_v31 = vld [vmem:[%s2130_s0 + $0x68] sm:$0xff] }
 0x40e   :  { %v622_v40 = vadd.f32 %v1126_v36, %v571_v30 }
 0x40f   :  { %v1128_v39 = vmul.f32 -1.442695, %v615_v35 }
 0x410   :  { %v1129_v41 = vmul.f32 -1.442695, %v622_v40 }
 0x411   :  { %1453 = vpow2.f32 %v1128_v39 }
 0x412   :  { %1455 = vpow2.f32 %v1129_v41 }
 0x41b   :  { %v1454_v42 = vpop.eup %1453 }
 0x41c   :  { %v619_v43 = vadd.f32 1.0, %v1454_v42  ;;  %v1456_v44 = vpop.eup %1455 }
 0x41d   :  { %v626_v45 = vadd.f32 1.0, %v1456_v44 }
 0x41e   :  { %1457 = vrcp.f32 %v619_v43 }
 0x41f   :  { %1459 = vrcp.f32 %v626_v45  ;;  %v1133_v45 = vld [vmem:[%s2130_s0 + $0x70] sm:$0xff] }
 0x428   :  { %v1458_v47 = vpop.eup %1457 }
 0x429   :  { %v629_v49 = vmul.f32 %v1458_v47, %v610_v46  ;;  %v1460_v51 = vpop.eup %1459 }
 0x42a   :  { %v632_v52 = vsub.f32 1.0, %v1460_v51  ;;  %v634_v56 = vmul.f32 %v1460_v51, %v1864_v60 }
 0x42b   :  { %v630_v50 = vadd.f32 %v1127_v48, %v629_v49 }
 0x42d   :  { %1461 = vtanh.f32 %v630_v50 }
 0x437   :  { %v1462_v54 = vpop.eup %1461 }
 0x438   :  { %v633_v55 = vmul.f32 %v1462_v54, %v632_v52 }
 0x43a   :  { %v1920_v57 = vadd.f32 %v634_v56, %v633_v55 }
 0x43c   :  { %1130 = vst [vmem:[%s2131_s3 + $0x18] sm:$0xff] %v1920_v57  ;;  %v644_v58 = vpack.c.bf16 %v1920_v57, %v1920_v57 }
 0x43e   :  { %678 = vmatmul.mubr.bf16.vlgmr.msra.gmra.mrb[16].mxu0 %v644_v58  ;;  %1324 = vmatmul.mubr.bf16.vlgmr.msra.gmra.mrb[16].mxu1 %v644_v58 }
 0x43f   :  { %757 = vmatpush1.bf16.msra.mxu0 %v1549_v3  ;;  %1328 = vmatpush3.bf16.msra.mxu1 %v1586_v9 }
 0x440   :  { %758 = vmatprep.subr.bf16.mxu0 %v1557_v4  ;;  %1329 = vmatprep.subr.bf16.mxu1 %v1515_v1 }
 0x441   :  { %788 = vmatprep.mubr.bf16.mxu0 %v1516_v2  ;;  %1343 = vmatprep.mubr.msk.bf16.mxu1 %vm1517_vm0, %v1515_v1 }
 0x443   :  { %759 = vmatpush1.bf16.msra.mxu0 %v1563_v5  ;;  %1330 = vmatpush3.bf16.msra.mxu1 %v1604_v12 }
 0x444   :  { %760 = vmatprep.subr.bf16.mxu0 %v1569_v6  ;;  %1331 = vmatprep.subr.bf16.mxu1 %v1515_v1 }
 0x447   :  { %761 = vmatpush1.bf16.msra.mxu0 %v1575_v7  ;;  %1332 = vmatpush3.bf16.msra.mxu1 %v1623_v15 }
 0x448   :  { %762 = vmatprep.subr.bf16.mxu0 %v1581_v8  ;;  %1333 = vmatprep.subr.bf16.mxu1 %v1515_v1 }
 0x44b   :  { %763 = vmatpush1.bf16.msra.mxu0 %v1592_v10  ;;  %1334 = vmatpush3.bf16.msra.mxu1 %v1642_v18 }
 0x44c   :  { %764 = vmatprep.subr.bf16.mxu0 %v1597_v11  ;;  %1335 = vmatprep.subr.bf16.mxu1 %v1515_v1 }
 0x44f   :  { %765 = vmatpush1.bf16.msra.mxu0 %v1610_v13  ;;  %1336 = vmatpush3.bf16.msra.mxu1 %v1661_v21 }
 0x450   :  { %766 = vmatprep.subr.bf16.mxu0 %v1616_v14  ;;  %1337 = vmatprep.subr.bf16.mxu1 %v1515_v1 }
 0x453   :  { %767 = vmatpush1.bf16.msra.mxu0 %v1630_v16  ;;  %1338 = vmatpush3.bf16.msra.mxu1 %v1675_v23 }
 0x454   :  { %768 = vmatprep.subr.bf16.mxu0 %v1636_v17  ;;  %1339 = vmatprep.subr.bf16.mxu1 %v1515_v1 }
 0x457   :  { %769 = vmatpush1.bf16.msra.mxu0 %v1649_v19  ;;  %1340 = vmatpush3.bf16.msra.mxu1 %v1683_v24 }
 0x458   :  { %770 = vmatprep.subr.bf16.mxu0 %v1655_v20  ;;  %1341 = vmatprep.subr.bf16.mxu1 %v1515_v1 }
 0x45b   :  { %771 = vmatpush1.bf16.msra.mxu0 %v1668_v22  ;;  %1342 = vmatpush3.bf16.msra.mxu1 %v1693_v26 }
 0x45c   :  { %867 = vmatprep.subr.bf16.mxu0 %v1542_v0  ;;  %1347 = vmatprep.subr.bf16.mxu1 %v1515_v1 }
 0x511   :  { %v679_v60 = vpop.f32.mrb[16].mxu0  ;;  %v720_v61 = vpop.f32.mrb[16].mxu1 }
 0x512   :  { %v680_v62 = vadd.f32 %v679_v60, %v1734_v32  ;;  %v681_v63 = vpop.f32.mrb[17].mxu0  ;;  %v1325_v25 = vpop.f32.mrb[17].mxu1  ;;  %v721_v43 = vadd.f32 %v720_v61, %v1746_v53 }
 0x513   :  { %v682_v27 = vadd.f32 %v681_v63, %v1736_v33  ;;  %v683_v28 = vpop.f32.mrb[18].mxu0  ;;  %v723_v29 = vpop.f32.mrb[18].mxu1 }
 0x514   :  { %v726_v30 = vadd.f32 %v1131_v59, %v680_v62  ;;  %v684_v34 = vpop.f32.mrb[19].mxu0  ;;  %v1326_v35 = vpop.f32.mrb[19].mxu1 }
 0x515   :  { %v733_v37 = vadd.f32 %v1132_v31, %v682_v27  ;;  %v1139_v27 = vld [vmem:[%s2130_s0 + $0x88] sm:$0xff] }
 0x516   :  { %v1134_v36 = vmul.f32 -1.442695, %v726_v30 }
 0x517   :  { %v1135_v38 = vmul.f32 -1.442695, %v733_v37 }
 0x518   :  { %1463 = vpow2.f32 %v1134_v36 }
 0x519   :  { %1465 = vpow2.f32 %v1135_v38 }
 0x522   :  { %v1464_v39 = vpop.eup %1463 }
 0x523   :  { %v730_v40 = vadd.f32 1.0, %v1464_v39  ;;  %v1466_v41 = vpop.eup %1465  ;;  %v1503_v39 = vld [vmem:[%s2128_s1] ss:$12 sps:$4 sm:$0xff]  }
 0x524   :  { %v737_v42 = vadd.f32 1.0, %v1466_v41  ;;  %v1505_v41 = vld [vmem:[%s2128_s1 + $0x1c] ss:$12 sps:$4 sm:$0xff]  }
 0x525   :  { %1467 = vrcp.f32 %v730_v40  ;;  %v1504_v40 = vld [vmem:[%s2128_s1 + $0x8] ss:$12 sps:$4 sm:$0xff]  }
 0x526   :  { %1469 = vrcp.f32 %v737_v42  ;;  %v1506_v42 = vld [vmem:[%s2128_s1 + $0x18] ss:$12 sps:$4 sm:$0xff]  }
 0x52f   :  { %v1468_v44 = vpop.eup %1467 }
 0x530   :  { %v740_v46 = vmul.f32 %v1468_v44, %v721_v43  ;;  %v1470_v48 = vpop.eup %1469  ;;  %v1507_v43 = vld [vmem:[%s2128_s1 + $0x20] ss:$12 sps:$4 sm:$0xff]  }
 0x531   :  { %v743_v49 = vsub.f32 1.0, %v1470_v48  ;;  %v745_v52 = vmul.f32 %v1470_v48, %v1920_v57  ;;  %v1508_v44 = vld [vmem:[%s2128_s1 + $0x34] ss:$12 sps:$4 sm:$0xff]   ;;  %v1514_v48 = vld [vmem:[%s2128_s1 + $0x7c] ss:$12 sps:$4 sm:$0xff]  }
 0x532   :  { %v741_v47 = vadd.f32 %v1133_v45, %v740_v46  ;;  %v1510_v45 = vld [vmem:[%s2128_s1 + $0x4c] ss:$12 sps:$4 sm:$0xff]   ;;  %v1511_v46 = vld [vmem:[%s2128_s1 + $0x48] ss:$12 sps:$4 sm:$0xff]  }
 0x534   :  { %1471 = vtanh.f32 %v741_v47  ;;  %v1512_v47 = vld [vmem:[%s2128_s1 + $0x64] ss:$12 sps:$4 sm:$0xff]  }
 0x53e   :  { %v1472_v50 = vpop.eup %1471 }
 0x53f   :  { %v744_v51 = vmul.f32 %v1472_v50, %v743_v49 }
 0x541   :  { %v1976_v54 = vadd.f32 %v745_v52, %v744_v51 }
 0x543   :  { %1136 = vst [vmem:[%s2131_s3 + $0x20] sm:$0xff] %v1976_v54  ;;  %v755_v55 = vpack.c.bf16 %v1976_v54, %v1976_v54 }
 0x545   :  { %789 = vmatmul.mubr.bf16.vlgmr.msra.gmra.mrb[20].mxu0 %v755_v55  ;;  %1344 = vmatmul.mubr.bf16.vlgmr.msra.gmra.mrb[20].mxu1 %v755_v55 }
 0x546   :  { %868 = vmatpush1.bf16.msra.mxu0 %v1549_v3  ;;  %1348 = vmatpush3.bf16.msra.mxu1 %v1586_v9  ;;  %v1137_v3 = vld [vmem:[%s2130_s0 + $0x78] sm:$0xff] }
 0x547   :  { %869 = vmatprep.subr.bf16.mxu0 %v1557_v4  ;;  %1349 = vmatprep.subr.bf16.mxu1 %v1515_v1 }
 0x548   :  { %899 = vmatprep.mubr.bf16.mxu0 %v1516_v2  ;;  %1363 = vmatprep.mubr.msk.bf16.mxu1 %vm1517_vm0, %v1515_v1 }
 0x54a   :  { %870 = vmatpush1.bf16.msra.mxu0 %v1563_v5  ;;  %1350 = vmatpush3.bf16.msra.mxu1 %v1604_v12 }
 0x54b   :  { %871 = vmatprep.subr.bf16.mxu0 %v1569_v6  ;;  %1351 = vmatprep.subr.bf16.mxu1 %v1515_v1 }
 0x54e   :  { %872 = vmatpush1.bf16.msra.mxu0 %v1575_v7  ;;  %1352 = vmatpush3.bf16.msra.mxu1 %v1623_v15 }
 0x54f   :  { %873 = vmatprep.subr.bf16.mxu0 %v1581_v8  ;;  %1353 = vmatprep.subr.bf16.mxu1 %v1515_v1 }
 0x552   :  { %874 = vmatpush1.bf16.msra.mxu0 %v1592_v10  ;;  %1354 = vmatpush3.bf16.msra.mxu1 %v1642_v18 }
 0x553   :  { %875 = vmatprep.subr.bf16.mxu0 %v1597_v11  ;;  %1355 = vmatprep.subr.bf16.mxu1 %v1515_v1 }
 0x556   :  { %876 = vmatpush1.bf16.msra.mxu0 %v1610_v13  ;;  %1356 = vmatpush3.bf16.msra.mxu1 %v1661_v21 }
 0x557   :  { %877 = vmatprep.subr.bf16.mxu0 %v1616_v14  ;;  %1357 = vmatprep.subr.bf16.mxu1 %v1515_v1 }
 0x55a   :  { %878 = vmatpush1.bf16.msra.mxu0 %v1630_v16  ;;  %1358 = vmatpush3.bf16.msra.mxu1 %v1675_v23 }
 0x55b   :  { %879 = vmatprep.subr.bf16.mxu0 %v1636_v17  ;;  %1359 = vmatprep.subr.bf16.mxu1 %v1515_v1 }
 0x55e   :  { %880 = vmatpush1.bf16.msra.mxu0 %v1649_v19  ;;  %1360 = vmatpush3.bf16.msra.mxu1 %v1683_v24 }
 0x55f   :  { %881 = vmatprep.subr.bf16.mxu0 %v1655_v20  ;;  %1361 = vmatprep.subr.bf16.mxu1 %v1515_v1 }
 0x562   :  { %882 = vmatpush1.bf16.msra.mxu0 %v1668_v22  ;;  %1362 = vmatpush3.bf16.msra.mxu1 %v1693_v26 }
 0x563   :  { %978 = vmatprep.subr.bf16.mxu0 %v1542_v0  ;;  %1367 = vmatprep.subr.bf16.mxu1 %v1515_v1  ;;  %v1138_v0 = vld [vmem:[%s2130_s0 + $0x80] sm:$0xff] }
 0x618   :  { %v790_v4 = vpop.f32.mrb[20].mxu0  ;;  %v831_v5 = vpop.f32.mrb[20].mxu1 }
 0x619   :  { %v791_v6 = vadd.f32 %v790_v4, %v1734_v32  ;;  %v792_v7 = vpop.f32.mrb[21].mxu0  ;;  %v1345_v8 = vpop.f32.mrb[21].mxu1  ;;  %v832_v63 = vadd.f32 %v831_v5, %v1746_v53 }
 0x61a   :  { %v793_v9 = vadd.f32 %v792_v7, %v1736_v33  ;;  %v794_v10 = vpop.f32.mrb[22].mxu0  ;;  %v834_v11 = vpop.f32.mrb[22].mxu1  ;;  %v1145_v8 = vld [vmem:[%s2130_s0 + $0xa0] sm:$0xff] }
 0x61b   :  { %v837_v12 = vadd.f32 %v1137_v3, %v791_v6  ;;  %v795_v13 = vpop.f32.mrb[23].mxu0  ;;  %v1346_v14 = vpop.f32.mrb[23].mxu1 }
 0x61c   :  { %v844_v57 = vadd.f32 %v1138_v0, %v793_v9 }
 0x61d   :  { %v1140_v56 = vmul.f32 -1.442695, %v837_v12 }
 0x61e   :  { %v1141_v58 = vmul.f32 -1.442695, %v844_v57 }
 0x61f   :  { %1473 = vpow2.f32 %v1140_v56 }
 0x620   :  { %1475 = vpow2.f32 %v1141_v58  ;;  %v1149_v58 = vld [vmem:[%s2130_s0 + $0xa8] sm:$0xff] }
 0x629   :  { %v1474_v59 = vpop.eup %1473 }
 0x62a   :  { %v841_v60 = vadd.f32 1.0, %v1474_v59  ;;  %v1476_v61 = vpop.eup %1475 }
 0x62b   :  { %v848_v62 = vadd.f32 1.0, %v1476_v61 }
 0x62c   :  { %1477 = vrcp.f32 %v841_v60 }
 0x62d   :  { %1479 = vrcp.f32 %v848_v62 }
 0x636   :  { %v1478_v25 = vpop.eup %1477 }
 0x637   :  { %v851_v28 = vmul.f32 %v1478_v25, %v832_v63  ;;  %v1480_v30 = vpop.eup %1479 }
 0x638   :  { %v854_v31 = vsub.f32 1.0, %v1480_v30  ;;  %v856_v36 = vmul.f32 %v1480_v30, %v1976_v54  ;;  %v1150_v30 = vld [vmem:[%s2130_s0 + $0xb0] sm:$0xff] }
 0x639   :  { %v852_v29 = vadd.f32 %v1139_v27, %v851_v28 }
 0x63b   :  { %1481 = vtanh.f32 %v852_v29 }
 0x645   :  { %v1482_v34 = vpop.eup %1481 }
 0x646   :  { %v855_v35 = vmul.f32 %v1482_v34, %v854_v31 }
 0x648   :  { %v2032_v37 = vadd.f32 %v856_v36, %v855_v35 }
 0x64a   :  { %1142 = vst [vmem:[%s2131_s3 + $0x28] sm:$0xff] %v2032_v37  ;;  %v866_v38 = vpack.c.bf16 %v2032_v37, %v2032_v37 }
 0x64c   :  { %900 = vmatmul.mubr.bf16.vlgmr.msra.gmra.mrb[24].mxu0 %v866_v38  ;;  %1364 = vmatmul.mubr.bf16.vlgmr.msra.gmra.mrb[24].mxu1 %v866_v38 }
 0x64d   :  { %979 = vmatpush1.bf16.msra.mxu0 %v1503_v39  ;;  %1368 = vmatpush3.bf16.msra.mxu1 %v1504_v40 }
 0x64e   :  { %980 = vmatprep.subr.bf16.mxu0 %v1505_v41  ;;  %1369 = vmatprep.subr.bf16.mxu1 %v1515_v1 }
 0x64f   :  { %1010 = vmatprep.mubr.bf16.mxu0 %v1516_v2  ;;  %1383 = vmatprep.mubr.msk.bf16.mxu1 %vm1517_vm0, %v1515_v1  ;;  %v1509_v2 = vld [vmem:[%s2128_s1 + $0x30] ss:$12 sps:$4 sm:$0xff]  }
 0x651   :  { %981 = vmatpush1.bf16.msra.mxu0 %v1506_v42  ;;  %1370 = vmatpush3.bf16.msra.mxu1 %v1507_v43  ;;  %v1151_v42 = vld [vmem:[%s2130_s0 + $0xb8] sm:$0xff] }
 0x652   :  { %982 = vmatprep.subr.bf16.mxu0 %v1508_v44  ;;  %1371 = vmatprep.subr.bf16.mxu1 %v1515_v1 }
 0x655   :  { %983 = vmatpush1.bf16.msra.mxu0 %v1509_v2  ;;  %1372 = vmatpush3.bf16.msra.mxu1 %v1623_v15  ;;  %v1513_v15 = vld [vmem:[%s2128_s1 + $0x60] ss:$12 sps:$4 sm:$0xff]  }
 0x656   :  { %984 = vmatprep.subr.bf16.mxu0 %v1510_v45  ;;  %1373 = vmatprep.subr.bf16.mxu1 %v1515_v1 }
 0x659   :  { %985 = vmatpush1.bf16.msra.mxu0 %v1511_v46  ;;  %1374 = vmatpush3.bf16.msra.mxu1 %v1642_v18 }
 0x65a   :  { %986 = vmatprep.subr.bf16.mxu0 %v1512_v47  ;;  %1375 = vmatprep.subr.bf16.mxu1 %v1515_v1 }
 0x65d   :  { %987 = vmatpush1.bf16.msra.mxu0 %v1513_v15  ;;  %1376 = vmatpush3.bf16.msra.mxu1 %v1661_v21 }
 0x65e   :  { %988 = vmatprep.subr.bf16.mxu0 %v1514_v48  ;;  %1377 = vmatprep.subr.bf16.mxu1 %v1515_v1 }
 0x661   :  { %989 = vmatpush1.bf16.msra.mxu0 %v1630_v16  ;;  %1378 = vmatpush3.bf16.msra.mxu1 %v1675_v23  ;;  %v1143_v16 = vld [vmem:[%s2130_s0 + $0x90] sm:$0xff] }
 0x662   :  { %990 = vmatprep.subr.bf16.mxu0 %v1636_v17  ;;  %1379 = vmatprep.subr.bf16.mxu1 %v1515_v1 }
 0x665   :  { %991 = vmatpush1.bf16.msra.mxu0 %v1649_v19  ;;  %1380 = vmatpush3.bf16.msra.mxu1 %v1683_v24 }
 0x666   :  { %992 = vmatprep.subr.bf16.mxu0 %v1655_v20  ;;  %1381 = vmatprep.subr.bf16.mxu1 %v1515_v1  ;;  %v1144_v1 = vld [vmem:[%s2130_s0 + $0x98] sm:$0xff] }
 0x669   :  { %993 = vmatpush1.bf16.msra.mxu0 %v1668_v22  ;;  %1382 = vmatpush3.bf16.msra.mxu1 %v1693_v26 }
 0x71f   :  { %v901_v18 = vpop.f32.mrb[24].mxu0  ;;  %v942_v17 = vpop.f32.mrb[24].mxu1 }
 0x720   :  { %v902_v21 = vadd.f32 %v901_v18, %v1734_v32  ;;  %v903_v23 = vpop.f32.mrb[25].mxu0  ;;  %v1365_v19 = vpop.f32.mrb[25].mxu1  ;;  %v943_v6 = vadd.f32 %v942_v17, %v1746_v53 }
 0x721   :  { %v904_v24 = vadd.f32 %v903_v23, %v1736_v33  ;;  %v905_v49 = vpop.f32.mrb[26].mxu0  ;;  %v945_v20 = vpop.f32.mrb[26].mxu1 }
 0x722   :  { %v948_v50 = vadd.f32 %v1143_v16, %v902_v21  ;;  %v906_v22 = vpop.f32.mrb[27].mxu0  ;;  %v1366_v26 = vpop.f32.mrb[27].mxu1 }
 0x723   :  { %v955_v52 = vadd.f32 %v1144_v1, %v904_v24 }
 0x724   :  { %v1146_v51 = vmul.f32 -1.442695, %v948_v50 }
 0x725   :  { %v1147_v54 = vmul.f32 -1.442695, %v955_v52 }
 0x726   :  { %1483 = vpow2.f32 %v1146_v51 }
 0x727   :  { %1485 = vpow2.f32 %v1147_v54 }
 0x730   :  { %v1484_v55 = vpop.eup %1483 }
 0x731   :  { %v952_v3 = vadd.f32 1.0, %v1484_v55  ;;  %v1486_v4 = vpop.eup %1485 }
 0x732   :  { %v959_v5 = vadd.f32 1.0, %v1486_v4 }
 0x733   :  { %1487 = vrcp.f32 %v952_v3 }
 0x734   :  { %1489 = vrcp.f32 %v959_v5 }
 0x73d   :  { %v1488_v7 = vpop.eup %1487 }
 0x73e   :  { %v962_v9 = vmul.f32 %v1488_v7, %v943_v6  ;;  %v1490_v11 = vpop.eup %1489 }
 0x73f   :  { %v965_v12 = vsub.f32 1.0, %v1490_v11  ;;  %v967_v14 = vmul.f32 %v1490_v11, %v2032_v37 }
 0x740   :  { %v963_v10 = vadd.f32 %v1145_v8, %v962_v9 }
 0x742   :  { %1491 = vtanh.f32 %v963_v10 }
 0x74c   :  { %v1492_v0 = vpop.eup %1491 }
 0x74d   :  { %v966_v13 = vmul.f32 %v1492_v0, %v965_v12 }
 0x74f   :  { %v968_v56 = vadd.f32 %v967_v14, %v966_v13 }
 0x751   :  { %1148 = vst [vmem:[%s2131_s3 + $0x30] sm:$0xff] %v968_v56  ;;  %v977_v57 = vpack.c.bf16 %v968_v56, %v968_v56 }
 0x753   :  { %1011 = vmatmul.mubr.bf16.vlgmr.msra.gmra.mrb[28].mxu0 %v977_v57  ;;  %1384 = vmatmul.mubr.bf16.vlgmr.msra.gmra.mrb[28].mxu1 %v977_v57 }
 0x826   :  { %v1012_v59 = vpop.f32.mrb[28].mxu0  ;;  %v1053_v60 = vpop.f32.mrb[28].mxu1 }
 0x827   :  { %v1013_v61 = vadd.f32 %v1012_v59, %v1734_v32  ;;  %v1014_v62 = vpop.f32.mrb[29].mxu0  ;;  %v1385_v63 = vpop.f32.mrb[29].mxu1 }
 0x828   :  { %v1015_v25 = vadd.f32 %v1014_v62, %v1736_v33  ;;  %v1016_v27 = vpop.f32.mrb[30].mxu0  ;;  %v1056_v28 = vpop.f32.mrb[30].mxu1  ;;  %v1054_v33 = vadd.f32 %v1053_v60, %v1746_v53 }
 0x829   :  { %v1059_v29 = vadd.f32 %v1149_v58, %v1013_v61  ;;  %v1017_v31 = vpop.f32.mrb[31].mxu0  ;;  %v1386_v34 = vpop.f32.mrb[31].mxu1 }
 0x82a   :  { %v1066_v36 = vadd.f32 %v1150_v30, %v1015_v25 }
 0x82b   :  { %v1152_v35 = vmul.f32 -1.442695, %v1059_v29 }
 0x82c   :  { %v1153_v37 = vmul.f32 -1.442695, %v1066_v36 }
 0x82d   :  { %1493 = vpow2.f32 %v1152_v35 }
 0x82e   :  { %1495 = vpow2.f32 %v1153_v37 }
 0x837   :  { %v1494_v38 = vpop.eup %1493 }
 0x838   :  { %v1063_v32 = vadd.f32 1.0, %v1494_v38  ;;  %v1496_v39 = vpop.eup %1495 }
 0x839   :  { %v1070_v40 = vadd.f32 1.0, %v1496_v39 }
 0x83a   :  { %1497 = vrcp.f32 %v1063_v32 }
 0x83b   :  { %1499 = vrcp.f32 %v1070_v40 }
 0x844   :  { %v1498_v41 = vpop.eup %1497 }
 0x845   :  { %v1073_v43 = vmul.f32 %v1498_v41, %v1054_v33  ;;  %v1500_v2 = vpop.eup %1499 }
 0x846   :  { %v1076_v45 = vsub.f32 1.0, %v1500_v2  ;;  %v1078_v15 = vmul.f32 %v1500_v2, %v968_v56 }
 0x847   :  { %v1074_v44 = vadd.f32 %v1151_v42, %v1073_v43 }
 0x849   :  { %1501 = vtanh.f32 %v1074_v44 }
 0x853   :  { %v1502_v46 = vpop.eup %1501 }
 0x854   :  { %v1077_v47 = vmul.f32 %v1502_v46, %v1076_v45 }
 0x856   :  { %v1079_v48 = vadd.f32 %v1078_v15, %v1077_v47 }
 0x858   :  { %1154 = vst [vmem:[%s2131_s3 + $0x38] sm:$0xff] %v1079_v48 }

</bundles_post_ra>
